<compile_context>
chip_gen: v7x
topology: tpu7x:2x2x1
jax: 0.10.0
libtpu: 0.0.40
codegen_flags: <defaults>
</compile_context>

<pallas_src>
import functools

import jax
import jax.numpy as jnp
import numpy as np
from jax import lax
from jax.experimental import pallas as pl
from jax.experimental.pallas import tpu as pltpu


def _round_up(x, m):
    return ((x + m - 1) // m) * m


def lstm_kernel(x_ref, wih_ref, whh_ref, b_ref, wlin_ref, blin_ref, out_ref):
    T, Bp, I = x_ref.shape
    Hp = whh_ref.shape[0]          # padded hidden size per gate (multiple of 128)

    # Hoisted out of the time loop: bf16 recurrent weights, input weights, bias.
    whh = whh_ref[...]             # (Hp, 4*Hp) bf16
    wih = wih_ref[...]             # (I, 4*Hp)  f32
    b = b_ref[...]                 # (1, 4*Hp)  f32

    def sigmoid(x):
        # One EUP tanh + VPU affine instead of exp + divide (exact identity).
        return 0.5 * jnp.tanh(0.5 * x) + 0.5

    # TODO(synk): for even lower per-step latency, stage whh in the MXU once via
    # pltpu.matmul_push_rhs / matmul_acc_lhs / matmul_pop instead of a jnp.dot
    # per step (hold-RHS-across-many-LHS case).

    h = jnp.zeros((Bp, Hp), jnp.float32)
    c = jnp.zeros((Bp, Hp), jnp.float32)

    # T is tiny and static: full unroll so the scheduler can overlap the VPU/EUP
    # gate math of step t with the MXU matmul of step t+1's dependencies.
    for t in range(T):
        x_t = x_ref[t]                                       # (Bp, I)
        if I == 1:
            # Outer-product input projection: pure VPU broadcast multiply,
            # computed per step (nothing big held live across the unroll).
            gx = x_t * wih + b                               # (Bp, 4*Hp)
        else:
            gx = jnp.dot(x_t, wih,
                         preferred_element_type=jnp.float32) + b

        # Recurrent matmul: bf16 operands, f32 accumulation on the MXU.
        gates = gx + jnp.dot(h.astype(jnp.bfloat16), whh,
                             preferred_element_type=jnp.float32)  # (Bp, 4*Hp)

        i_g = sigmoid(gates[:, 0 * Hp:1 * Hp])
        f_g = sigmoid(gates[:, 1 * Hp:2 * Hp])
        g_g = jnp.tanh(gates[:, 2 * Hp:3 * Hp])
        o_g = sigmoid(gates[:, 3 * Hp:4 * Hp])
        c = f_g * c + i_g * g_g
        h = o_g * jnp.tanh(c)

    # Final linear on the last hidden state; lane-dense (Bp, Op) store.
    out_ref[...] = (jnp.dot(h, wlin_ref[...],
                            preferred_element_type=jnp.float32)
                    + blin_ref[...])


def pack_lstm_params(params):
    """One-time packing of PyTorch-layout LSTM + Linear weights into the
    lane-dense, gate-stacked layout the kernel consumes.

    Call this ONCE (at init / load time), not per forward call.

    Returns (wih_s, whh_s, b_s, wlin_p, blin_p):
      wih_s  : (I, 4*Hp)   f32, gate order i,f,g,o, per-gate lane padded
      whh_s  : (Hp, 4*Hp)  bf16, gate-stacked, zero padded
      b_s    : (1, 4*Hp)   f32, b_ih + b_hh per gate
      wlin_p : (Hp, Op)    f32
      blin_p : (1, Op)     f32
    """
    w_ih, w_hh, b_ih, b_hh, w_lin, b_lin = params
    H = w_hh.shape[1]
    I = w_ih.shape[1]
    O = w_lin.shape[0]

    # Keep per-gate lane padding at 128 (do NOT pad the contraction dim to 256:
    # (128, 512) already maps cleanly onto the MXU tiles on v5e/v6e/v7x).
    Hp = _round_up(H, 128)
    Op = _round_up(O, 128)
    f32 = jnp.float32

    # W_ih -> (I, 4*Hp).
    wih_g = w_ih.reshape(4, H, I).transpose(0, 2, 1)                # (4, I, H)
    wih_s = jnp.zeros((4, I, Hp), f32).at[:, :, :H].set(wih_g)
    wih_s = wih_s.transpose(1, 0, 2).reshape(I, 4 * Hp)

    # W_hh -> (Hp, 4*Hp), stored in bf16 for the recurrent MXU matmul.
    # TODO(synk): for large H (Hp >= 1024) tile the 4*Hp gate axis with a
    # BlockSpec / emit_pipeline so double-buffered residency stays under the
    # v7x 64 MiB VMEM (and the 32 MiB default scoped limit).
    whh_g = w_hh.reshape(4, H, H).transpose(0, 2, 1)                # (4, H_in, H_out)
    whh_s = jnp.zeros((4, Hp, Hp), f32).at[:, :H, :H].set(whh_g)
    whh_s = whh_s.transpose(1, 0, 2).reshape(Hp, 4 * Hp).astype(jnp.bfloat16)

    # Combined bias (b_ih + b_hh), gate-stacked, zero-padded.
    b_s = jnp.zeros((4, Hp), f32).at[:, :H].set((b_ih + b_hh).reshape(4, H))
    b_s = b_s.reshape(1, 4 * Hp)

    # Final linear, transposed + zero-padded.
    wlin_p = jnp.zeros((Hp, Op), f32).at[:H, :O].set(w_lin.T)
    blin_p = jnp.zeros((1, Op), f32).at[:, :O].set(b_lin.reshape(1, O))

    return (wih_s, whh_s, b_s, wlin_p, blin_p)


@functools.partial(jax.jit, static_argnames=("out_features",))
def lstm_forward(input_seq, packed, out_features):
    """input_seq: (T, B, I) f32, packed = pack_lstm_params(params) -> (B, O) f32."""
    wih_s, whh_s, b_s, wlin_p, blin_p = packed
    T, B, I = input_seq.shape
    Hp = whh_s.shape[0]
    Op = wlin_p.shape[1]
    Bp = max(8, _round_up(B, 8))            # sublane-pad batch

    # Zero-pad the batch axis (padded rows never touch real rows).
    x_p = jnp.zeros((T, Bp, I), jnp.float32).at[:, :B, :].set(input_seq)

    # Everything easily fits in VMEM at these sizes: single invocation, no grid.
    # TODO(synk): for large T, stream x over a T-chunk grid (BlockSpec, axis
    # "arbitrary") with h/c in persistent VMEM scratch; for large batch on v7x
    # add a "parallel" batch grid axis so the second TensorCore is used.
    vmem = pl.BlockSpec(memory_space=pltpu.MemorySpace.VMEM)
    out_p = pl.pallas_call(
        lstm_kernel,
        out_shape=jax.ShapeDtypeStruct((Bp, Op), jnp.float32),
        in_specs=[vmem] * 6,
        out_specs=vmem,
    )(x_p, wih_s, whh_s, b_s, wlin_p, blin_p)

    return out_p[:B, :out_features]


def lstm_reference(input_seq, params):
    """Pure-JAX f32 reference matching torch.nn.LSTM + Linear semantics."""
    w_ih, w_hh, b_ih, b_hh, w_lin, b_lin = params
    T, B, I = input_seq.shape
    H = w_hh.shape[1]

    def step(carry, x_t):
        h, c = carry
        gates = x_t @ w_ih.T + h @ w_hh.T + b_ih + b_hh   # (B, 4H)
        i = jax.nn.sigmoid(gates[:, 0 * H:1 * H])
        f = jax.nn.sigmoid(gates[:, 1 * H:2 * H])
        g = jnp.tanh(gates[:, 2 * H:3 * H])
        o = jax.nn.sigmoid(gates[:, 3 * H:4 * H])
        c = f * c + i * g
        h = o * jnp.tanh(c)
        return (h, c), h

    (h_T, _), _ = lax.scan(step,
                           (jnp.zeros((B, H), jnp.float32),
                            jnp.zeros((B, H), jnp.float32)),
                           input_seq)
    return h_T @ w_lin.T + b_lin


def init_params(key, input_size=1, hidden=50, output=1):
    # Deterministic init mimicking PyTorch's U(-1/sqrt(H), 1/sqrt(H)).
    std = 1.0 / np.sqrt(hidden)
    ks = jax.random.split(key, 6)
    w_ih = jax.random.uniform(ks[0], (4 * hidden, input_size),
                              minval=-std, maxval=std, dtype=jnp.float32)
    w_hh = jax.random.uniform(ks[1], (4 * hidden, hidden),
                              minval=-std, maxval=std, dtype=jnp.float32)
    b_ih = jax.random.uniform(ks[2], (4 * hidden,),
                              minval=-std, maxval=std, dtype=jnp.float32)
    b_hh = jax.random.uniform(ks[3], (4 * hidden,),
                              minval=-std, maxval=std, dtype=jnp.float32)
    w_lin = jax.random.uniform(ks[4], (output, hidden),
                               minval=-std, maxval=std, dtype=jnp.float32)
    b_lin = jax.random.uniform(ks[5], (output,),
                               minval=-std, maxval=std, dtype=jnp.float32)
    return (w_ih, w_hh, b_ih, b_hh, w_lin, b_lin)


if __name__ == "__main__":
    T, B, I, H, O = 8, 4, 1, 50, 1
    key = jax.random.PRNGKey(0)
    k_x, k_p = jax.random.split(key)

    input_seq = jax.random.normal(k_x, (T, B, I), dtype=jnp.float32)
    params = init_params(k_p, input_size=I, hidden=H, output=O)

    # One-time weight packing (hoisted out of the per-call path).
    packed = jax.tree_util.tree_map(jax.block_until_ready,
                                    pack_lstm_params(params))

    out = lstm_forward(input_seq, packed, out_features=O)
    out = jax.block_until_ready(out)

    ref = jax.block_until_ready(lstm_reference(input_seq, params))
    # Looser tolerance: recurrent matmul uses bf16 operands (f32 accumulation).
    np.testing.assert_allclose(np.asarray(out), np.asarray(ref),
                               rtol=3e-2, atol=3e-2)

    print("KERNEL_OK")
</pallas_src>

<mosaic_0001>
module attributes {stable_mosaic.version = 11 : i64} {
  func.func @lstm_kernel(%arg0: memref<8x8x1xf32, #tpu.memory_space<vmem>>, %arg1: memref<1x512xf32, #tpu.memory_space<vmem>>, %arg2: memref<128x512xbf16, #tpu.memory_space<vmem>>, %arg3: memref<1x512xf32, #tpu.memory_space<vmem>>, %arg4: memref<128x128xf32, #tpu.memory_space<vmem>>, %arg5: memref<1x128xf32, #tpu.memory_space<vmem>>, %arg6: memref<8x128xf32, #tpu.memory_space<vmem>>) attributes {dimension_semantics = [], scalar_prefetch = 0 : i64, scratch_operands = 0 : i64, tpu.core_type = #tpu.core_type<tc>} {
    %c0 = arith.constant 0 : index
    %c0_0 = arith.constant 0 : index
    %0 = vector.load %arg2[%c0, %c0_0] : memref<128x512xbf16, #tpu.memory_space<vmem>>, vector<128x512xbf16>
    %c0_1 = arith.constant 0 : index
    %c0_2 = arith.constant 0 : index
    %1 = vector.load %arg1[%c0_1, %c0_2] : memref<1x512xf32, #tpu.memory_space<vmem>>, vector<1x512xf32>
    %c0_3 = arith.constant 0 : index
    %c0_4 = arith.constant 0 : index
    %2 = vector.load %arg3[%c0_3, %c0_4] : memref<1x512xf32, #tpu.memory_space<vmem>>, vector<1x512xf32>
    %cst = arith.constant 0.000000e+00 : f32
    %3 = vector.broadcast %cst : f32 to vector<8x128xf32>
    %cst_5 = arith.constant 0.000000e+00 : f32
    %4 = vector.broadcast %cst_5 : f32 to vector<8x128xf32>
    %c0_6 = arith.constant 0 : index
    %c0_7 = arith.constant 0 : index
    %c0_8 = arith.constant 0 : index
    %5 = vector.load %arg0[%c0_6, %c0_7, %c0_8] : memref<8x8x1xf32, #tpu.memory_space<vmem>>, vector<1x8x1xf32>
    %6 = vector.shape_cast %5 : vector<1x8x1xf32> to vector<8x1xf32>
    %7 = vector.broadcast %6 : vector<8x1xf32> to vector<8x512xf32>
    %8 = vector.broadcast %1 : vector<1x512xf32> to vector<8x512xf32>
    %9 = arith.mulf %7, %8 : vector<8x512xf32>
    %10 = vector.broadcast %2 : vector<1x512xf32> to vector<8x512xf32>
    %11 = arith.addf %9, %10 : vector<8x512xf32>
    %12 = arith.truncf %3 : vector<8x128xf32> to vector<8x128xbf16>
    %cst_9 = arith.constant dense<0.000000e+00> : vector<8x512xf32>
    %13 = tpu.matmul %12, %0, %cst_9 {dimension_numbers = #tpu.dot_dimension_numbers<[1], [0], [0], [1], [0, 0, 1, 1], [], []>} : vector<8x128xbf16>, vector<128x512xbf16>, vector<8x512xf32> -> vector<8x512xf32>
    %14 = arith.addf %11, %13 : vector<8x512xf32>
    %15 = vector.extract_strided_slice %14 {offsets = [0, 0], sizes = [8, 128], strides = [1, 1]} : vector<8x512xf32> to vector<8x128xf32>
    %cst_10 = arith.constant 5.000000e-01 : f32
    %16 = vector.broadcast %cst_10 : f32 to vector<8x128xf32>
    %17 = arith.mulf %16, %15 : vector<8x128xf32>
    %18 = math.tanh %17 : vector<8x128xf32>
    %cst_11 = arith.constant 5.000000e-01 : f32
    %19 = vector.broadcast %cst_11 : f32 to vector<8x128xf32>
    %20 = arith.mulf %19, %18 : vector<8x128xf32>
    %cst_12 = arith.constant 5.000000e-01 : f32
    %21 = vector.broadcast %cst_12 : f32 to vector<8x128xf32>
    %22 = arith.addf %20, %21 : vector<8x128xf32>
    %23 = vector.extract_strided_slice %14 {offsets = [0, 128], sizes = [8, 128], strides = [1, 1]} : vector<8x512xf32> to vector<8x128xf32>
    %cst_13 = arith.constant 5.000000e-01 : f32
    %24 = vector.broadcast %cst_13 : f32 to vector<8x128xf32>
    %25 = arith.mulf %24, %23 : vector<8x128xf32>
    %26 = math.tanh %25 : vector<8x128xf32>
    %cst_14 = arith.constant 5.000000e-01 : f32
    %27 = vector.broadcast %cst_14 : f32 to vector<8x128xf32>
    %28 = arith.mulf %27, %26 : vector<8x128xf32>
    %cst_15 = arith.constant 5.000000e-01 : f32
    %29 = vector.broadcast %cst_15 : f32 to vector<8x128xf32>
    %30 = arith.addf %28, %29 : vector<8x128xf32>
    %31 = vector.extract_strided_slice %14 {offsets = [0, 256], sizes = [8, 128], strides = [1, 1]} : vector<8x512xf32> to vector<8x128xf32>
    %32 = math.tanh %31 : vector<8x128xf32>
    %33 = vector.extract_strided_slice %14 {offsets = [0, 384], sizes = [8, 128], strides = [1, 1]} : vector<8x512xf32> to vector<8x128xf32>
    %cst_16 = arith.constant 5.000000e-01 : f32
    %34 = vector.broadcast %cst_16 : f32 to vector<8x128xf32>
    %35 = arith.mulf %34, %33 : vector<8x128xf32>
    %36 = math.tanh %35 : vector<8x128xf32>
    %cst_17 = arith.constant 5.000000e-01 : f32
    %37 = vector.broadcast %cst_17 : f32 to vector<8x128xf32>
    %38 = arith.mulf %37, %36 : vector<8x128xf32>
    %cst_18 = arith.constant 5.000000e-01 : f32
    %39 = vector.broadcast %cst_18 : f32 to vector<8x128xf32>
    %40 = arith.addf %38, %39 : vector<8x128xf32>
    %41 = arith.mulf %30, %4 : vector<8x128xf32>
    %42 = arith.mulf %22, %32 : vector<8x128xf32>
    %43 = arith.addf %41, %42 : vector<8x128xf32>
    %44 = math.tanh %43 : vector<8x128xf32>
    %45 = arith.mulf %40, %44 : vector<8x128xf32>
    %c1 = arith.constant 1 : index
    %c0_19 = arith.constant 0 : index
    %c0_20 = arith.constant 0 : index
    %46 = vector.load %arg0[%c1, %c0_19, %c0_20] : memref<8x8x1xf32, #tpu.memory_space<vmem>>, vector<1x8x1xf32>
    %47 = vector.shape_cast %46 : vector<1x8x1xf32> to vector<8x1xf32>
    %48 = vector.broadcast %47 : vector<8x1xf32> to vector<8x512xf32>
    %49 = vector.broadcast %1 : vector<1x512xf32> to vector<8x512xf32>
    %50 = arith.mulf %48, %49 : vector<8x512xf32>
    %51 = vector.broadcast %2 : vector<1x512xf32> to vector<8x512xf32>
    %52 = arith.addf %50, %51 : vector<8x512xf32>
    %53 = arith.truncf %45 : vector<8x128xf32> to vector<8x128xbf16>
    %cst_21 = arith.constant dense<0.000000e+00> : vector<8x512xf32>
    %54 = tpu.matmul %53, %0, %cst_21 {dimension_numbers = #tpu.dot_dimension_numbers<[1], [0], [0], [1], [0, 0, 1, 1], [], []>} : vector<8x128xbf16>, vector<128x512xbf16>, vector<8x512xf32> -> vector<8x512xf32>
    %55 = arith.addf %52, %54 : vector<8x512xf32>
    %56 = vector.extract_strided_slice %55 {offsets = [0, 0], sizes = [8, 128], strides = [1, 1]} : vector<8x512xf32> to vector<8x128xf32>
    %cst_22 = arith.constant 5.000000e-01 : f32
    %57 = vector.broadcast %cst_22 : f32 to vector<8x128xf32>
    %58 = arith.mulf %57, %56 : vector<8x128xf32>
    %59 = math.tanh %58 : vector<8x128xf32>
    %cst_23 = arith.constant 5.000000e-01 : f32
    %60 = vector.broadcast %cst_23 : f32 to vector<8x128xf32>
    %61 = arith.mulf %60, %59 : vector<8x128xf32>
    %cst_24 = arith.constant 5.000000e-01 : f32
    %62 = vector.broadcast %cst_24 : f32 to vector<8x128xf32>
    %63 = arith.addf %61, %62 : vector<8x128xf32>
    %64 = vector.extract_strided_slice %55 {offsets = [0, 128], sizes = [8, 128], strides = [1, 1]} : vector<8x512xf32> to vector<8x128xf32>
    %cst_25 = arith.constant 5.000000e-01 : f32
    %65 = vector.broadcast %cst_25 : f32 to vector<8x128xf32>
    %66 = arith.mulf %65, %64 : vector<8x128xf32>
    %67 = math.tanh %66 : vector<8x128xf32>
    %cst_26 = arith.constant 5.000000e-01 : f32
    %68 = vector.broadcast %cst_26 : f32 to vector<8x128xf32>
    %69 = arith.mulf %68, %67 : vector<8x128xf32>
    %cst_27 = arith.constant 5.000000e-01 : f32
    %70 = vector.broadcast %cst_27 : f32 to vector<8x128xf32>
    %71 = arith.addf %69, %70 : vector<8x128xf32>
    %72 = vector.extract_strided_slice %55 {offsets = [0, 256], sizes = [8, 128], strides = [1, 1]} : vector<8x512xf32> to vector<8x128xf32>
    %73 = math.tanh %72 : vector<8x128xf32>
    %74 = vector.extract_strided_slice %55 {offsets = [0, 384], sizes = [8, 128], strides = [1, 1]} : vector<8x512xf32> to vector<8x128xf32>
    %cst_28 = arith.constant 5.000000e-01 : f32
    %75 = vector.broadcast %cst_28 : f32 to vector<8x128xf32>
    %76 = arith.mulf %75, %74 : vector<8x128xf32>
    %77 = math.tanh %76 : vector<8x128xf32>
    %cst_29 = arith.constant 5.000000e-01 : f32
    %78 = vector.broadcast %cst_29 : f32 to vector<8x128xf32>
    %79 = arith.mulf %78, %77 : vector<8x128xf32>
    %cst_30 = arith.constant 5.000000e-01 : f32
    %80 = vector.broadcast %cst_30 : f32 to vector<8x128xf32>
    %81 = arith.addf %79, %80 : vector<8x128xf32>
    %82 = arith.mulf %71, %43 : vector<8x128xf32>
    %83 = arith.mulf %63, %73 : vector<8x128xf32>
    %84 = arith.addf %82, %83 : vector<8x128xf32>
    %85 = math.tanh %84 : vector<8x128xf32>
    %86 = arith.mulf %81, %85 : vector<8x128xf32>
    %c2 = arith.constant 2 : index
    %c0_31 = arith.constant 0 : index
    %c0_32 = arith.constant 0 : index
    %87 = vector.load %arg0[%c2, %c0_31, %c0_32] : memref<8x8x1xf32, #tpu.memory_space<vmem>>, vector<1x8x1xf32>
    %88 = vector.shape_cast %87 : vector<1x8x1xf32> to vector<8x1xf32>
    %89 = vector.broadcast %88 : vector<8x1xf32> to vector<8x512xf32>
    %90 = vector.broadcast %1 : vector<1x512xf32> to vector<8x512xf32>
    %91 = arith.mulf %89, %90 : vector<8x512xf32>
    %92 = vector.broadcast %2 : vector<1x512xf32> to vector<8x512xf32>
    %93 = arith.addf %91, %92 : vector<8x512xf32>
    %94 = arith.truncf %86 : vector<8x128xf32> to vector<8x128xbf16>
    %cst_33 = arith.constant dense<0.000000e+00> : vector<8x512xf32>
    %95 = tpu.matmul %94, %0, %cst_33 {dimension_numbers = #tpu.dot_dimension_numbers<[1], [0], [0], [1], [0, 0, 1, 1], [], []>} : vector<8x128xbf16>, vector<128x512xbf16>, vector<8x512xf32> -> vector<8x512xf32>
    %96 = arith.addf %93, %95 : vector<8x512xf32>
    %97 = vector.extract_strided_slice %96 {offsets = [0, 0], sizes = [8, 128], strides = [1, 1]} : vector<8x512xf32> to vector<8x128xf32>
    %cst_34 = arith.constant 5.000000e-01 : f32
    %98 = vector.broadcast %cst_34 : f32 to vector<8x128xf32>
    %99 = arith.mulf %98, %97 : vector<8x128xf32>
    %100 = math.tanh %99 : vector<8x128xf32>
    %cst_35 = arith.constant 5.000000e-01 : f32
    %101 = vector.broadcast %cst_35 : f32 to vector<8x128xf32>
    %102 = arith.mulf %101, %100 : vector<8x128xf32>
    %cst_36 = arith.constant 5.000000e-01 : f32
    %103 = vector.broadcast %cst_36 : f32 to vector<8x128xf32>
    %104 = arith.addf %102, %103 : vector<8x128xf32>
    %105 = vector.extract_strided_slice %96 {offsets = [0, 128], sizes = [8, 128], strides = [1, 1]} : vector<8x512xf32> to vector<8x128xf32>
    %cst_37 = arith.constant 5.000000e-01 : f32
    %106 = vector.broadcast %cst_37 : f32 to vector<8x128xf32>
    %107 = arith.mulf %106, %105 : vector<8x128xf32>
    %108 = math.tanh %107 : vector<8x128xf32>
    %cst_38 = arith.constant 5.000000e-01 : f32
    %109 = vector.broadcast %cst_38 : f32 to vector<8x128xf32>
    %110 = arith.mulf %109, %108 : vector<8x128xf32>
    %cst_39 = arith.constant 5.000000e-01 : f32
    %111 = vector.broadcast %cst_39 : f32 to vector<8x128xf32>
    %112 = arith.addf %110, %111 : vector<8x128xf32>
    %113 = vector.extract_strided_slice %96 {offsets = [0, 256], sizes = [8, 128], strides = [1, 1]} : vector<8x512xf32> to vector<8x128xf32>
    %114 = math.tanh %113 : vector<8x128xf32>
    %115 = vector.extract_strided_slice %96 {offsets = [0, 384], sizes = [8, 128], strides = [1, 1]} : vector<8x512xf32> to vector<8x128xf32>
    %cst_40 = arith.constant 5.000000e-01 : f32
    %116 = vector.broadcast %cst_40 : f32 to vector<8x128xf32>
    %117 = arith.mulf %116, %115 : vector<8x128xf32>
    %118 = math.tanh %117 : vector<8x128xf32>
    %cst_41 = arith.constant 5.000000e-01 : f32
    %119 = vector.broadcast %cst_41 : f32 to vector<8x128xf32>
    %120 = arith.mulf %119, %118 : vector<8x128xf32>
    %cst_42 = arith.constant 5.000000e-01 : f32
    %121 = vector.broadcast %cst_42 : f32 to vector<8x128xf32>
    %122 = arith.addf %120, %121 : vector<8x128xf32>
    %123 = arith.mulf %112, %84 : vector<8x128xf32>
    %124 = arith.mulf %104, %114 : vector<8x128xf32>
    %125 = arith.addf %123, %124 : vector<8x128xf32>
    %126 = math.tanh %125 : vector<8x128xf32>
    %127 = arith.mulf %122, %126 : vector<8x128xf32>
    %c3 = arith.constant 3 : index
    %c0_43 = arith.constant 0 : index
    %c0_44 = arith.constant 0 : index
    %128 = vector.load %arg0[%c3, %c0_43, %c0_44] : memref<8x8x1xf32, #tpu.memory_space<vmem>>, vector<1x8x1xf32>
    %129 = vector.shape_cast %128 : vector<1x8x1xf32> to vector<8x1xf32>
    %130 = vector.broadcast %129 : vector<8x1xf32> to vector<8x512xf32>
    %131 = vector.broadcast %1 : vector<1x512xf32> to vector<8x512xf32>
    %132 = arith.mulf %130, %131 : vector<8x512xf32>
    %133 = vector.broadcast %2 : vector<1x512xf32> to vector<8x512xf32>
    %134 = arith.addf %132, %133 : vector<8x512xf32>
    %135 = arith.truncf %127 : vector<8x128xf32> to vector<8x128xbf16>
    %cst_45 = arith.constant dense<0.000000e+00> : vector<8x512xf32>
    %136 = tpu.matmul %135, %0, %cst_45 {dimension_numbers = #tpu.dot_dimension_numbers<[1], [0], [0], [1], [0, 0, 1, 1], [], []>} : vector<8x128xbf16>, vector<128x512xbf16>, vector<8x512xf32> -> vector<8x512xf32>
    %137 = arith.addf %134, %136 : vector<8x512xf32>
    %138 = vector.extract_strided_slice %137 {offsets = [0, 0], sizes = [8, 128], strides = [1, 1]} : vector<8x512xf32> to vector<8x128xf32>
    %cst_46 = arith.constant 5.000000e-01 : f32
    %139 = vector.broadcast %cst_46 : f32 to vector<8x128xf32>
    %140 = arith.mulf %139, %138 : vector<8x128xf32>
    %141 = math.tanh %140 : vector<8x128xf32>
    %cst_47 = arith.constant 5.000000e-01 : f32
    %142 = vector.broadcast %cst_47 : f32 to vector<8x128xf32>
    %143 = arith.mulf %142, %141 : vector<8x128xf32>
    %cst_48 = arith.constant 5.000000e-01 : f32
    %144 = vector.broadcast %cst_48 : f32 to vector<8x128xf32>
    %145 = arith.addf %143, %144 : vector<8x128xf32>
    %146 = vector.extract_strided_slice %137 {offsets = [0, 128], sizes = [8, 128], strides = [1, 1]} : vector<8x512xf32> to vector<8x128xf32>
    %cst_49 = arith.constant 5.000000e-01 : f32
    %147 = vector.broadcast %cst_49 : f32 to vector<8x128xf32>
    %148 = arith.mulf %147, %146 : vector<8x128xf32>
    %149 = math.tanh %148 : vector<8x128xf32>
    %cst_50 = arith.constant 5.000000e-01 : f32
    %150 = vector.broadcast %cst_50 : f32 to vector<8x128xf32>
    %151 = arith.mulf %150, %149 : vector<8x128xf32>
    %cst_51 = arith.constant 5.000000e-01 : f32
    %152 = vector.broadcast %cst_51 : f32 to vector<8x128xf32>
    %153 = arith.addf %151, %152 : vector<8x128xf32>
    %154 = vector.extract_strided_slice %137 {offsets = [0, 256], sizes = [8, 128], strides = [1, 1]} : vector<8x512xf32> to vector<8x128xf32>
    %155 = math.tanh %154 : vector<8x128xf32>
    %156 = vector.extract_strided_slice %137 {offsets = [0, 384], sizes = [8, 128], strides = [1, 1]} : vector<8x512xf32> to vector<8x128xf32>
    %cst_52 = arith.constant 5.000000e-01 : f32
    %157 = vector.broadcast %cst_52 : f32 to vector<8x128xf32>
    %158 = arith.mulf %157, %156 : vector<8x128xf32>
    %159 = math.tanh %158 : vector<8x128xf32>
    %cst_53 = arith.constant 5.000000e-01 : f32
    %160 = vector.broadcast %cst_53 : f32 to vector<8x128xf32>
    %161 = arith.mulf %160, %159 : vector<8x128xf32>
    %cst_54 = arith.constant 5.000000e-01 : f32
    %162 = vector.broadcast %cst_54 : f32 to vector<8x128xf32>
    %163 = arith.addf %161, %162 : vector<8x128xf32>
    %164 = arith.mulf %153, %125 : vector<8x128xf32>
    %165 = arith.mulf %145, %155 : vector<8x128xf32>
    %166 = arith.addf %164, %165 : vector<8x128xf32>
    %167 = math.tanh %166 : vector<8x128xf32>
    %168 = arith.mulf %163, %167 : vector<8x128xf32>
    %c4 = arith.constant 4 : index
    %c0_55 = arith.constant 0 : index
    %c0_56 = arith.constant 0 : index
    %169 = vector.load %arg0[%c4, %c0_55, %c0_56] : memref<8x8x1xf32, #tpu.memory_space<vmem>>, vector<1x8x1xf32>
    %170 = vector.shape_cast %169 : vector<1x8x1xf32> to vector<8x1xf32>
    %171 = vector.broadcast %170 : vector<8x1xf32> to vector<8x512xf32>
    %172 = vector.broadcast %1 : vector<1x512xf32> to vector<8x512xf32>
    %173 = arith.mulf %171, %172 : vector<8x512xf32>
    %174 = vector.broadcast %2 : vector<1x512xf32> to vector<8x512xf32>
    %175 = arith.addf %173, %174 : vector<8x512xf32>
    %176 = arith.truncf %168 : vector<8x128xf32> to vector<8x128xbf16>
    %cst_57 = arith.constant dense<0.000000e+00> : vector<8x512xf32>
    %177 = tpu.matmul %176, %0, %cst_57 {dimension_numbers = #tpu.dot_dimension_numbers<[1], [0], [0], [1], [0, 0, 1, 1], [], []>} : vector<8x128xbf16>, vector<128x512xbf16>, vector<8x512xf32> -> vector<8x512xf32>
    %178 = arith.addf %175, %177 : vector<8x512xf32>
    %179 = vector.extract_strided_slice %178 {offsets = [0, 0], sizes = [8, 128], strides = [1, 1]} : vector<8x512xf32> to vector<8x128xf32>
    %cst_58 = arith.constant 5.000000e-01 : f32
    %180 = vector.broadcast %cst_58 : f32 to vector<8x128xf32>
    %181 = arith.mulf %180, %179 : vector<8x128xf32>
    %182 = math.tanh %181 : vector<8x128xf32>
    %cst_59 = arith.constant 5.000000e-01 : f32
    %183 = vector.broadcast %cst_59 : f32 to vector<8x128xf32>
    %184 = arith.mulf %183, %182 : vector<8x128xf32>
    %cst_60 = arith.constant 5.000000e-01 : f32
    %185 = vector.broadcast %cst_60 : f32 to vector<8x128xf32>
    %186 = arith.addf %184, %185 : vector<8x128xf32>
    %187 = vector.extract_strided_slice %178 {offsets = [0, 128], sizes = [8, 128], strides = [1, 1]} : vector<8x512xf32> to vector<8x128xf32>
    %cst_61 = arith.constant 5.000000e-01 : f32
    %188 = vector.broadcast %cst_61 : f32 to vector<8x128xf32>
    %189 = arith.mulf %188, %187 : vector<8x128xf32>
    %190 = math.tanh %189 : vector<8x128xf32>
    %cst_62 = arith.constant 5.000000e-01 : f32
    %191 = vector.broadcast %cst_62 : f32 to vector<8x128xf32>
    %192 = arith.mulf %191, %190 : vector<8x128xf32>
    %cst_63 = arith.constant 5.000000e-01 : f32
    %193 = vector.broadcast %cst_63 : f32 to vector<8x128xf32>
    %194 = arith.addf %192, %193 : vector<8x128xf32>
    %195 = vector.extract_strided_slice %178 {offsets = [0, 256], sizes = [8, 128], strides = [1, 1]} : vector<8x512xf32> to vector<8x128xf32>
    %196 = math.tanh %195 : vector<8x128xf32>
    %197 = vector.extract_strided_slice %178 {offsets = [0, 384], sizes = [8, 128], strides = [1, 1]} : vector<8x512xf32> to vector<8x128xf32>
    %cst_64 = arith.constant 5.000000e-01 : f32
    %198 = vector.broadcast %cst_64 : f32 to vector<8x128xf32>
    %199 = arith.mulf %198, %197 : vector<8x128xf32>
    %200 = math.tanh %199 : vector<8x128xf32>
    %cst_65 = arith.constant 5.000000e-01 : f32
    %201 = vector.broadcast %cst_65 : f32 to vector<8x128xf32>
    %202 = arith.mulf %201, %200 : vector<8x128xf32>
    %cst_66 = arith.constant 5.000000e-01 : f32
    %203 = vector.broadcast %cst_66 : f32 to vector<8x128xf32>
    %204 = arith.addf %202, %203 : vector<8x128xf32>
    %205 = arith.mulf %194, %166 : vector<8x128xf32>
    %206 = arith.mulf %186, %196 : vector<8x128xf32>
    %207 = arith.addf %205, %206 : vector<8x128xf32>
    %208 = math.tanh %207 : vector<8x128xf32>
    %209 = arith.mulf %204, %208 : vector<8x128xf32>
    %c5 = arith.constant 5 : index
    %c0_67 = arith.constant 0 : index
    %c0_68 = arith.constant 0 : index
    %210 = vector.load %arg0[%c5, %c0_67, %c0_68] : memref<8x8x1xf32, #tpu.memory_space<vmem>>, vector<1x8x1xf32>
    %211 = vector.shape_cast %210 : vector<1x8x1xf32> to vector<8x1xf32>
    %212 = vector.broadcast %211 : vector<8x1xf32> to vector<8x512xf32>
    %213 = vector.broadcast %1 : vector<1x512xf32> to vector<8x512xf32>
    %214 = arith.mulf %212, %213 : vector<8x512xf32>
    %215 = vector.broadcast %2 : vector<1x512xf32> to vector<8x512xf32>
    %216 = arith.addf %214, %215 : vector<8x512xf32>
    %217 = arith.truncf %209 : vector<8x128xf32> to vector<8x128xbf16>
    %cst_69 = arith.constant dense<0.000000e+00> : vector<8x512xf32>
    %218 = tpu.matmul %217, %0, %cst_69 {dimension_numbers = #tpu.dot_dimension_numbers<[1], [0], [0], [1], [0, 0, 1, 1], [], []>} : vector<8x128xbf16>, vector<128x512xbf16>, vector<8x512xf32> -> vector<8x512xf32>
    %219 = arith.addf %216, %218 : vector<8x512xf32>
    %220 = vector.extract_strided_slice %219 {offsets = [0, 0], sizes = [8, 128], strides = [1, 1]} : vector<8x512xf32> to vector<8x128xf32>
    %cst_70 = arith.constant 5.000000e-01 : f32
    %221 = vector.broadcast %cst_70 : f32 to vector<8x128xf32>
    %222 = arith.mulf %221, %220 : vector<8x128xf32>
    %223 = math.tanh %222 : vector<8x128xf32>
    %cst_71 = arith.constant 5.000000e-01 : f32
    %224 = vector.broadcast %cst_71 : f32 to vector<8x128xf32>
    %225 = arith.mulf %224, %223 : vector<8x128xf32>
    %cst_72 = arith.constant 5.000000e-01 : f32
    %226 = vector.broadcast %cst_72 : f32 to vector<8x128xf32>
    %227 = arith.addf %225, %226 : vector<8x128xf32>
    %228 = vector.extract_strided_slice %219 {offsets = [0, 128], sizes = [8, 128], strides = [1, 1]} : vector<8x512xf32> to vector<8x128xf32>
    %cst_73 = arith.constant 5.000000e-01 : f32
    %229 = vector.broadcast %cst_73 : f32 to vector<8x128xf32>
    %230 = arith.mulf %229, %228 : vector<8x128xf32>
    %231 = math.tanh %230 : vector<8x128xf32>
    %cst_74 = arith.constant 5.000000e-01 : f32
    %232 = vector.broadcast %cst_74 : f32 to vector<8x128xf32>
    %233 = arith.mulf %232, %231 : vector<8x128xf32>
    %cst_75 = arith.constant 5.000000e-01 : f32
    %234 = vector.broadcast %cst_75 : f32 to vector<8x128xf32>
    %235 = arith.addf %233, %234 : vector<8x128xf32>
    %236 = vector.extract_strided_slice %219 {offsets = [0, 256], sizes = [8, 128], strides = [1, 1]} : vector<8x512xf32> to vector<8x128xf32>
    %237 = math.tanh %236 : vector<8x128xf32>
    %238 = vector.extract_strided_slice %219 {offsets = [0, 384], sizes = [8, 128], strides = [1, 1]} : vector<8x512xf32> to vector<8x128xf32>
    %cst_76 = arith.constant 5.000000e-01 : f32
    %239 = vector.broadcast %cst_76 : f32 to vector<8x128xf32>
    %240 = arith.mulf %239, %238 : vector<8x128xf32>
    %241 = math.tanh %240 : vector<8x128xf32>
    %cst_77 = arith.constant 5.000000e-01 : f32
    %242 = vector.broadcast %cst_77 : f32 to vector<8x128xf32>
    %243 = arith.mulf %242, %241 : vector<8x128xf32>
    %cst_78 = arith.constant 5.000000e-01 : f32
    %244 = vector.broadcast %cst_78 : f32 to vector<8x128xf32>
    %245 = arith.addf %243, %244 : vector<8x128xf32>
    %246 = arith.mulf %235, %207 : vector<8x128xf32>
    %247 = arith.mulf %227, %237 : vector<8x128xf32>
    %248 = arith.addf %246, %247 : vector<8x128xf32>
    %249 = math.tanh %248 : vector<8x128xf32>
    %250 = arith.mulf %245, %249 : vector<8x128xf32>
    %c6 = arith.constant 6 : index
    %c0_79 = arith.constant 0 : index
    %c0_80 = arith.constant 0 : index
    %251 = vector.load %arg0[%c6, %c0_79, %c0_80] : memref<8x8x1xf32, #tpu.memory_space<vmem>>, vector<1x8x1xf32>
    %252 = vector.shape_cast %251 : vector<1x8x1xf32> to vector<8x1xf32>
    %253 = vector.broadcast %252 : vector<8x1xf32> to vector<8x512xf32>
    %254 = vector.broadcast %1 : vector<1x512xf32> to vector<8x512xf32>
    %255 = arith.mulf %253, %254 : vector<8x512xf32>
    %256 = vector.broadcast %2 : vector<1x512xf32> to vector<8x512xf32>
    %257 = arith.addf %255, %256 : vector<8x512xf32>
    %258 = arith.truncf %250 : vector<8x128xf32> to vector<8x128xbf16>
    %cst_81 = arith.constant dense<0.000000e+00> : vector<8x512xf32>
    %259 = tpu.matmul %258, %0, %cst_81 {dimension_numbers = #tpu.dot_dimension_numbers<[1], [0], [0], [1], [0, 0, 1, 1], [], []>} : vector<8x128xbf16>, vector<128x512xbf16>, vector<8x512xf32> -> vector<8x512xf32>
    %260 = arith.addf %257, %259 : vector<8x512xf32>
    %261 = vector.extract_strided_slice %260 {offsets = [0, 0], sizes = [8, 128], strides = [1, 1]} : vector<8x512xf32> to vector<8x128xf32>
    %cst_82 = arith.constant 5.000000e-01 : f32
    %262 = vector.broadcast %cst_82 : f32 to vector<8x128xf32>
    %263 = arith.mulf %262, %261 : vector<8x128xf32>
    %264 = math.tanh %263 : vector<8x128xf32>
    %cst_83 = arith.constant 5.000000e-01 : f32
    %265 = vector.broadcast %cst_83 : f32 to vector<8x128xf32>
    %266 = arith.mulf %265, %264 : vector<8x128xf32>
    %cst_84 = arith.constant 5.000000e-01 : f32
    %267 = vector.broadcast %cst_84 : f32 to vector<8x128xf32>
    %268 = arith.addf %266, %267 : vector<8x128xf32>
    %269 = vector.extract_strided_slice %260 {offsets = [0, 128], sizes = [8, 128], strides = [1, 1]} : vector<8x512xf32> to vector<8x128xf32>
    %cst_85 = arith.constant 5.000000e-01 : f32
    %270 = vector.broadcast %cst_85 : f32 to vector<8x128xf32>
    %271 = arith.mulf %270, %269 : vector<8x128xf32>
    %272 = math.tanh %271 : vector<8x128xf32>
    %cst_86 = arith.constant 5.000000e-01 : f32
    %273 = vector.broadcast %cst_86 : f32 to vector<8x128xf32>
    %274 = arith.mulf %273, %272 : vector<8x128xf32>
    %cst_87 = arith.constant 5.000000e-01 : f32
    %275 = vector.broadcast %cst_87 : f32 to vector<8x128xf32>
    %276 = arith.addf %274, %275 : vector<8x128xf32>
    %277 = vector.extract_strided_slice %260 {offsets = [0, 256], sizes = [8, 128], strides = [1, 1]} : vector<8x512xf32> to vector<8x128xf32>
    %278 = math.tanh %277 : vector<8x128xf32>
    %279 = vector.extract_strided_slice %260 {offsets = [0, 384], sizes = [8, 128], strides = [1, 1]} : vector<8x512xf32> to vector<8x128xf32>
    %cst_88 = arith.constant 5.000000e-01 : f32
    %280 = vector.broadcast %cst_88 : f32 to vector<8x128xf32>
    %281 = arith.mulf %280, %279 : vector<8x128xf32>
    %282 = math.tanh %281 : vector<8x128xf32>
    %cst_89 = arith.constant 5.000000e-01 : f32
    %283 = vector.broadcast %cst_89 : f32 to vector<8x128xf32>
    %284 = arith.mulf %283, %282 : vector<8x128xf32>
    %cst_90 = arith.constant 5.000000e-01 : f32
    %285 = vector.broadcast %cst_90 : f32 to vector<8x128xf32>
    %286 = arith.addf %284, %285 : vector<8x128xf32>
    %287 = arith.mulf %276, %248 : vector<8x128xf32>
    %288 = arith.mulf %268, %278 : vector<8x128xf32>
    %289 = arith.addf %287, %288 : vector<8x128xf32>
    %290 = math.tanh %289 : vector<8x128xf32>
    %291 = arith.mulf %286, %290 : vector<8x128xf32>
    %c7 = arith.constant 7 : index
    %c0_91 = arith.constant 0 : index
    %c0_92 = arith.constant 0 : index
    %292 = vector.load %arg0[%c7, %c0_91, %c0_92] : memref<8x8x1xf32, #tpu.memory_space<vmem>>, vector<1x8x1xf32>
    %293 = vector.shape_cast %292 : vector<1x8x1xf32> to vector<8x1xf32>
    %294 = vector.broadcast %293 : vector<8x1xf32> to vector<8x512xf32>
    %295 = vector.broadcast %1 : vector<1x512xf32> to vector<8x512xf32>
    %296 = arith.mulf %294, %295 : vector<8x512xf32>
    %297 = vector.broadcast %2 : vector<1x512xf32> to vector<8x512xf32>
    %298 = arith.addf %296, %297 : vector<8x512xf32>
    %299 = arith.truncf %291 : vector<8x128xf32> to vector<8x128xbf16>
    %cst_93 = arith.constant dense<0.000000e+00> : vector<8x512xf32>
    %300 = tpu.matmul %299, %0, %cst_93 {dimension_numbers = #tpu.dot_dimension_numbers<[1], [0], [0], [1], [0, 0, 1, 1], [], []>} : vector<8x128xbf16>, vector<128x512xbf16>, vector<8x512xf32> -> vector<8x512xf32>
    %301 = arith.addf %298, %300 : vector<8x512xf32>
    %302 = vector.extract_strided_slice %301 {offsets = [0, 0], sizes = [8, 128], strides = [1, 1]} : vector<8x512xf32> to vector<8x128xf32>
    %cst_94 = arith.constant 5.000000e-01 : f32
    %303 = vector.broadcast %cst_94 : f32 to vector<8x128xf32>
    %304 = arith.mulf %303, %302 : vector<8x128xf32>
    %305 = math.tanh %304 : vector<8x128xf32>
    %cst_95 = arith.constant 5.000000e-01 : f32
    %306 = vector.broadcast %cst_95 : f32 to vector<8x128xf32>
    %307 = arith.mulf %306, %305 : vector<8x128xf32>
    %cst_96 = arith.constant 5.000000e-01 : f32
    %308 = vector.broadcast %cst_96 : f32 to vector<8x128xf32>
    %309 = arith.addf %307, %308 : vector<8x128xf32>
    %310 = vector.extract_strided_slice %301 {offsets = [0, 128], sizes = [8, 128], strides = [1, 1]} : vector<8x512xf32> to vector<8x128xf32>
    %cst_97 = arith.constant 5.000000e-01 : f32
    %311 = vector.broadcast %cst_97 : f32 to vector<8x128xf32>
    %312 = arith.mulf %311, %310 : vector<8x128xf32>
    %313 = math.tanh %312 : vector<8x128xf32>
    %cst_98 = arith.constant 5.000000e-01 : f32
    %314 = vector.broadcast %cst_98 : f32 to vector<8x128xf32>
    %315 = arith.mulf %314, %313 : vector<8x128xf32>
    %cst_99 = arith.constant 5.000000e-01 : f32
    %316 = vector.broadcast %cst_99 : f32 to vector<8x128xf32>
    %317 = arith.addf %315, %316 : vector<8x128xf32>
    %318 = vector.extract_strided_slice %301 {offsets = [0, 256], sizes = [8, 128], strides = [1, 1]} : vector<8x512xf32> to vector<8x128xf32>
    %319 = math.tanh %318 : vector<8x128xf32>
    %320 = vector.extract_strided_slice %301 {offsets = [0, 384], sizes = [8, 128], strides = [1, 1]} : vector<8x512xf32> to vector<8x128xf32>
    %cst_100 = arith.constant 5.000000e-01 : f32
    %321 = vector.broadcast %cst_100 : f32 to vector<8x128xf32>
    %322 = arith.mulf %321, %320 : vector<8x128xf32>
    %323 = math.tanh %322 : vector<8x128xf32>
    %cst_101 = arith.constant 5.000000e-01 : f32
    %324 = vector.broadcast %cst_101 : f32 to vector<8x128xf32>
    %325 = arith.mulf %324, %323 : vector<8x128xf32>
    %cst_102 = arith.constant 5.000000e-01 : f32
    %326 = vector.broadcast %cst_102 : f32 to vector<8x128xf32>
    %327 = arith.addf %325, %326 : vector<8x128xf32>
    %328 = arith.mulf %317, %289 : vector<8x128xf32>
    %329 = arith.mulf %309, %319 : vector<8x128xf32>
    %330 = arith.addf %328, %329 : vector<8x128xf32>
    %331 = math.tanh %330 : vector<8x128xf32>
    %332 = arith.mulf %327, %331 : vector<8x128xf32>
    %c0_103 = arith.constant 0 : index
    %c0_104 = arith.constant 0 : index
    %333 = vector.load %arg4[%c0_103, %c0_104] : memref<128x128xf32, #tpu.memory_space<vmem>>, vector<128x128xf32>
    %cst_105 = arith.constant dense<0.000000e+00> : vector<8x128xf32>
    %334 = tpu.matmul %332, %333, %cst_105 {dimension_numbers = #tpu.dot_dimension_numbers<[1], [0], [0], [1], [0, 0, 1, 1], [], []>} : vector<8x128xf32>, vector<128x128xf32>, vector<8x128xf32> -> vector<8x128xf32>
    %c0_106 = arith.constant 0 : index
    %c0_107 = arith.constant 0 : index
    %335 = vector.load %arg5[%c0_106, %c0_107] : memref<1x128xf32, #tpu.memory_space<vmem>>, vector<1x128xf32>
    %336 = vector.broadcast %335 : vector<1x128xf32> to vector<8x128xf32>
    %337 = arith.addf %334, %336 : vector<8x128xf32>
    %c0_108 = arith.constant 0 : index
    %c0_109 = arith.constant 0 : index
    %338 = vector.load %arg6[%c0_108, %c0_109] : memref<8x128xf32, #tpu.memory_space<vmem>>, vector<8x128xf32>
    tpu.vector_store %arg6[%c0_108, %c0_109], %337 {strides = array<i32>} : memref<8x128xf32, #tpu.memory_space<vmem>>, vector<8x128xf32>,
    return
  }
}

</mosaic_0001>

<bundles_post_ra>
// kernel: lstm_forward.1
= control target key start
LH: loop header
LB: loop body
LE: loop exit
PB: predicated region body
PF: predicated region fallthrough
CT: control target
= control target key end

     0   :  { %11 = vsyncpa [#allocation3], 0  ;;  %s1640_s21 = smov [#allocation2]   ;;  %s2227_s0 = inlined_call_operand.vmem [shape: f32[8,8,1], index: 0, kind: input, shape index: {}]   ;;  %s2228_s1 = inlined_call_operand.vmem [shape: f32[1,512], index: 1, kind: input, shape index: {}]   ;;  %s2229_s2 = inlined_call_operand.hbm [shape: bf16[128,512], index: 2, kind: input, shape index: {}]   ;;  %s2230_s3 = inlined_call_operand.vmem [shape: f32[1,512], index: 3, kind: input, shape index: {}]   ;;  %s2231_s4 = inlined_call_operand.vmem [shape: f32[128,128], index: 4, kind: input, shape index: {}]   ;;  %s2232_s5 = inlined_call_operand.vmem [shape: f32[1,128], index: 5, kind: input, shape index: {}]   ;;  %s2233_s6 = inlined_call_operand.vmem [shape: f32[8,128], index: 6, kind: output, shape index: {}]  }
   0x1   :  { %s21_s22 = sshll.u32 %s1640_s21, 4  ;;  %s1616_s25 = scalar_lea.hbm %s2229_s2, 4096  ;;  %s22_s22 = int_to_ptr.vmem [resolvable:$true] %s21_s22 }
   0x2   :  { %p1617_p0 = scmp.ne.s32.totalorder %s2229_s2, %s1616_s25  ;;  %p1620_p1 = scmp.lt.u32.totalorder %s1616_s25, %s2229_s2 }
   0x4   :  { %p1622_p2 = pnand %p1620_p1, %p1617_p0 }
   0x6   :  { %1625 = shalt.err (!%p1622_p2)
}
   0x7   :  { %s1626_s30 = scalar_lea.vmem %s22_s22, 4096  ;;  %p1631_p4 = scmp.lt.s32.totalorder %s22_s22, %s22_s22 }
   0x8   :  { %p1627_p3 = scmp.ne.s32.totalorder %s22_s22, %s1626_s30  ;;  %p1632_p5 = scmp.lt.s32.totalorder %s1626_s30, %s1626_s30 }
   0xa   :  { %p1633_p6 = por %p1632_p5, %p1631_p4 }
   0xc   :  { %p1634_p7 = pnand %p1633_p6, %p1627_p3 }
   0xe   :  { %1637 = shalt.err (!%p1634_p7)
}
   0xf   :  { %s1641_s7 = smov 256   ;;  %s1642_s8 = smov 16  }
  0x10   :  { %27 = dma.hbm_to_vmem [thread:$0]  %s2229_s2, 4096, %s22_s22, [#allocation3], %s1641_s7, %s1641_s7, %s1642_s8  }
  0x11   :  { %1638 = dma.done.wait [#allocation3], 4096  }
  0x12   :  { %1639 = vsyncadd [#allocation3], 4294963200  ;;  %v1643_v0 = vmov 0   ;;  %v1698_v1 = vld [vmem:[#allocation2 + $0x4] ss:$16 sps:$4 sm:$0xff]   ;;  %v1363_v28 = vld [vmem:[%s2227_s0 + $0x8] sm:$0xff]  ;;  %v79_v37 = vlaneseq }
  0x13   :  { %320 = vmatprep.mubr.bf16.mxu0 %v1643_v0  ;;  %361 = vmatprep.mubr.bf16.mxu1 %v1643_v0  ;;  %v1700_v2 = vld [vmem:[#allocation2 + $0xc] ss:$16 sps:$4 sm:$0xff]   ;;  %v1703_v3 = vld [vmem:[#allocation2] ss:$16 sps:$4 sm:$0xff]   ;;  %v1705_v4 = vld [vmem:[#allocation2 + $0x8] ss:$16 sps:$4 sm:$0xff]  }
  0x14   :  { %1454 = vset.pattern.permute.xlu0 %v1643_v0  ;;  %1455 = vset.pattern.permute.xlu1 %v1643_v0  ;;  %v1708_v5 = vld [vmem:[#allocation2 + $0x24] ss:$16 sps:$4 sm:$0xff]   ;;  %v1712_v6 = vld [vmem:[#allocation2 + $0x2c] ss:$16 sps:$4 sm:$0xff]   ;;  %v1714_v7 = vld [vmem:[#allocation2 + $0x20] ss:$16 sps:$4 sm:$0xff]  }
  0x15   :  { %288 = vmatprep.subr.bf16.mxu0 %v1698_v1  ;;  %329 = vmatprep.subr.bf16.mxu1 %v1700_v2  ;;  %v1717_v8 = vld [vmem:[#allocation2 + $0x28] ss:$16 sps:$4 sm:$0xff]   ;;  %v1720_v9 = vld [vmem:[#allocation2 + $0x44] ss:$16 sps:$4 sm:$0xff]   ;;  %v1722_v10 = vld [vmem:[#allocation2 + $0x4c] ss:$16 sps:$4 sm:$0xff]  }
  0x16   :  { %289 = vmatpush1.bf16.msra.mxu0 %v1703_v3  ;;  %330 = vmatpush1.bf16.msra.mxu1 %v1705_v4  ;;  %v1724_v11 = vld [vmem:[#allocation2 + $0x40] ss:$16 sps:$4 sm:$0xff]   ;;  %v1726_v12 = vld [vmem:[#allocation2 + $0x48] ss:$16 sps:$4 sm:$0xff]   ;;  %v1730_v13 = vld [vmem:[#allocation2 + $0x64] ss:$16 sps:$4 sm:$0xff]  }
  0x17   :  { %290 = vmatprep.subr.bf16.mxu0 %v1708_v5  ;;  %331 = vmatprep.subr.bf16.mxu1 %v1712_v6  ;;  %v1734_v14 = vld [vmem:[#allocation2 + $0x6c] ss:$16 sps:$4 sm:$0xff]   ;;  %v1736_v15 = vld [vmem:[#allocation2 + $0x60] ss:$16 sps:$4 sm:$0xff]   ;;  %v1740_v16 = vld [vmem:[#allocation2 + $0x68] ss:$16 sps:$4 sm:$0xff]  }
  0x18   :  { %v1742_v17 = vld [vmem:[#allocation2 + $0x84] ss:$16 sps:$4 sm:$0xff]   ;;  %v1746_v18 = vld [vmem:[#allocation2 + $0x8c] ss:$16 sps:$4 sm:$0xff]   ;;  %v1748_v19 = vld [vmem:[#allocation2 + $0x80] ss:$16 sps:$4 sm:$0xff]  }
  0x19   :  { %v1750_v20 = vld [vmem:[#allocation2 + $0x88] ss:$16 sps:$4 sm:$0xff]   ;;  %v1754_v21 = vld [vmem:[#allocation2 + $0xa4] ss:$16 sps:$4 sm:$0xff]   ;;  %v1758_v22 = vld [vmem:[#allocation2 + $0xac] ss:$16 sps:$4 sm:$0xff]  }
  0x1a   :  { %291 = vmatpush1.bf16.msra.mxu0 %v1714_v7  ;;  %332 = vmatpush1.bf16.msra.mxu1 %v1717_v8  ;;  %v1762_v23 = vld [vmem:[#allocation2 + $0xa0] ss:$16 sps:$4 sm:$0xff]   ;;  %v1764_v24 = vld [vmem:[#allocation2 + $0xa8] ss:$16 sps:$4 sm:$0xff]   ;;  %v1768_v25 = vld [vmem:[#allocation2 + $0xc4] ss:$16 sps:$4 sm:$0xff]  }
  0x1b   :  { %292 = vmatprep.subr.bf16.mxu0 %v1720_v9  ;;  %333 = vmatprep.subr.bf16.mxu1 %v1722_v10  ;;  %v1770_v26 = vld [vmem:[#allocation2 + $0xcc] ss:$16 sps:$4 sm:$0xff]   ;;  %v72_v27 = vld [vmem:[%s2227_s0] sm:$0xff]  ;;  %v1782_v30 = vld [vmem:[#allocation2 + $0xc8] ss:$16 sps:$4 sm:$0xff]   ;;  %v80_v38 = vshrl.u32 %v79_v37, 7 }
  0x1c   :  { %75 = vperm.xlu0 %1454, %v72_v27   ;;  %v1780_v29 = vld [vmem:[#allocation2 + $0xc0] ss:$16 sps:$4 sm:$0xff]   ;;  %v1786_v31 = vld [vmem:[#allocation2 + $0xe4] ss:$16 sps:$4 sm:$0xff]   ;;  %v1788_v32 = vld [vmem:[#allocation2 + $0xec] ss:$16 sps:$4 sm:$0xff]  }
  0x1d   :  { %v1366_v33 = vld [vmem:[%s2227_s0 + $0x20] sm:$0xff]  ;;  %v1797_v35 = vld [vmem:[#allocation2 + $0xe8] ss:$16 sps:$4 sm:$0xff]   ;;  %v1368_v36 = vld [vmem:[%s2227_s0 + $0x30] sm:$0xff]  ;;  %v81_v39 = vsub.s32 0, %v80_v38  ;;  %v85_v40 = vsub.s32 1, %v80_v38 }
  0x1e   :  { %293 = vmatpush1.bf16.msra.mxu0 %v1724_v11  ;;  %334 = vmatpush1.bf16.msra.mxu1 %v1726_v12  ;;  %v1795_v34 = vld [vmem:[#allocation2 + $0xe0] ss:$16 sps:$4 sm:$0xff]   ;;  %v89_v42 = vsub.s32 2, %v80_v38  ;;  %v93_v47 = vsub.s32 3, %v80_v38  ;;  %vm1645_vm0 = vmmov 0  }
  0x1f   :  { %294 = vmatprep.subr.bf16.mxu0 %v1730_v13  ;;  %335 = vmatprep.subr.bf16.mxu1 %v1734_v14  ;;  %v70_v41 = vld [vmem:[%s2228_s1] sm:$0xf] }
  0x20   :  { %396 = vperm.xlu0 %1454, %v1363_v28   ;;  %v1847_v43 = vrot.slane %v70_v41, %v81_v39  ;;  %v1849_v44 = vrot.slane %v70_v41, %v85_v40  ;;  %v71_v45 = vld [vmem:[%s2230_s3] sm:$0xf]  ;;  %v1854_v48 = vrot.slane %v70_v41, %v89_v42  ;;  %v1862_v53 = vrot.slane %v70_v41, %v93_v47 }
  0x21   :  { %v1857_v50 = vrot.slane %v71_v45, %v81_v39  ;;  %v1860_v52 = vrot.slane %v71_v45, %v85_v40  ;;  %v1866_v56 = vrot.slane %v71_v45, %v89_v42  ;;  %v1871_v27 = vrot.slane %v71_v45, %v93_v47 }
  0x22   :  { %295 = vmatpush1.bf16.msra.mxu0 %v1736_v15  ;;  %336 = vmatpush1.bf16.msra.mxu1 %v1740_v16 }
  0x23   :  { %296 = vmatprep.subr.bf16.mxu0 %v1742_v17  ;;  %337 = vmatprep.subr.bf16.mxu1 %v1746_v18 }
  0x24   :  { %756 = vperm.xlu0 %1454, %v1366_v33  }
  0x26   :  { %297 = vmatpush1.bf16.msra.mxu0 %v1748_v19  ;;  %338 = vmatpush1.bf16.msra.mxu1 %v1750_v20 }
  0x27   :  { %298 = vmatprep.subr.bf16.mxu0 %v1754_v21  ;;  %339 = vmatprep.subr.bf16.mxu1 %v1758_v22 }
  0x28   :  { %996 = vperm.xlu0 %1454, %v1368_v36  }
  0x2a   :  { %299 = vmatpush1.bf16.msra.mxu0 %v1762_v23  ;;  %340 = vmatpush1.bf16.msra.mxu1 %v1764_v24 }
  0x2b   :  { %300 = vmatprep.subr.bf16.mxu0 %v1768_v25  ;;  %341 = vmatprep.subr.bf16.mxu1 %v1770_v26 }
  0x2e   :  { %301 = vmatpush1.bf16.msra.mxu0 %v1780_v29  ;;  %342 = vmatpush1.bf16.msra.mxu1 %v1782_v30 }
  0x2f   :  { %302 = vmatprep.subr.bf16.mxu0 %v1786_v31  ;;  %343 = vmatprep.subr.bf16.mxu1 %v1788_v32 }
  0x32   :  { %303 = vmatpush1.bf16.msra.mxu0 %v1795_v34  ;;  %344 = vmatpush1.bf16.msra.mxu1 %v1797_v35 }
  0x33   :  { %408 = vmatprep.subr.bf16.mxu0 %v1698_v1  ;;  %449 = vmatprep.subr.bf16.mxu1 %v1700_v2 }
  0x35   :  { %321 = vmatmul.mubr.bf16.vlgmr.msra.gmra.mrb[0].mxu0 %v1643_v0  ;;  %362 = vmatmul.mubr.bf16.vlgmr.msra.gmra.mrb[0].mxu1 %v1643_v0 }
  0x36   :  { %409 = vmatpush1.bf16.msra.mxu0 %v1703_v3  ;;  %450 = vmatpush1.bf16.msra.mxu1 %v1705_v4 }
  0x37   :  { %410 = vmatprep.subr.bf16.mxu0 %v1708_v5  ;;  %451 = vmatprep.subr.bf16.mxu1 %v1712_v6 }
  0x38   :  { %440 = vmatprep.mubr.bf16.mxu0 %v1643_v0  ;;  %481 = vmatprep.mubr.bf16.mxu1 %v1643_v0 }
  0x3a   :  { %411 = vmatpush1.bf16.msra.mxu0 %v1714_v7  ;;  %452 = vmatpush1.bf16.msra.mxu1 %v1717_v8 }
  0x3b   :  { %412 = vmatprep.subr.bf16.mxu0 %v1720_v9  ;;  %453 = vmatprep.subr.bf16.mxu1 %v1722_v10 }
  0x3e   :  { %413 = vmatpush1.bf16.msra.mxu0 %v1724_v11  ;;  %454 = vmatpush1.bf16.msra.mxu1 %v1726_v12 }
  0x3f   :  { %414 = vmatprep.subr.bf16.mxu0 %v1730_v13  ;;  %455 = vmatprep.subr.bf16.mxu1 %v1734_v14 }
  0x42   :  { %415 = vmatpush1.bf16.msra.mxu0 %v1736_v15  ;;  %456 = vmatpush1.bf16.msra.mxu1 %v1740_v16 }
  0x43   :  { %416 = vmatprep.subr.bf16.mxu0 %v1742_v17  ;;  %457 = vmatprep.subr.bf16.mxu1 %v1746_v18 }
  0x46   :  { %417 = vmatpush1.bf16.msra.mxu0 %v1748_v19  ;;  %458 = vmatpush1.bf16.msra.mxu1 %v1750_v20 }
  0x47   :  { %418 = vmatprep.subr.bf16.mxu0 %v1754_v21  ;;  %459 = vmatprep.subr.bf16.mxu1 %v1758_v22 }
  0x4a   :  { %419 = vmatpush1.bf16.msra.mxu0 %v1762_v23  ;;  %460 = vmatpush1.bf16.msra.mxu1 %v1764_v24 }
  0x4b   :  { %420 = vmatprep.subr.bf16.mxu0 %v1768_v25  ;;  %461 = vmatprep.subr.bf16.mxu1 %v1770_v26 }
  0x4e   :  { %421 = vmatpush1.bf16.msra.mxu0 %v1780_v29  ;;  %462 = vmatpush1.bf16.msra.mxu1 %v1782_v30 }
  0x4f   :  { %422 = vmatprep.subr.bf16.mxu0 %v1786_v31  ;;  %463 = vmatprep.subr.bf16.mxu1 %v1788_v32 }
  0x52   :  { %423 = vmatpush1.bf16.msra.mxu0 %v1795_v34  ;;  %464 = vmatpush1.bf16.msra.mxu1 %v1797_v35 }
  0x53   :  { %528 = vmatprep.subr.bf16.mxu0 %v1698_v1  ;;  %569 = vmatprep.subr.bf16.mxu1 %v1700_v2 }
  0x9b   :  { %v76_v46 = vpop.permute.xlu0 %75 }
  0x9c   :  { %v99_v49 = vmul.f32 %v1847_v43, %v76_v46  ;;  %v100_v51 = vmul.f32 %v1849_v44, %v76_v46  ;;  %v101_v55 = vmul.f32 %v1854_v48, %v76_v46  ;;  %v102_v63 = vmul.f32 %v1862_v53, %v76_v46 }
  0x9e   :  { %v124_v54 = vadd.f32 %v1857_v50, %v99_v49  ;;  %v125_v57 = vadd.f32 %v1860_v52, %v100_v51  ;;  %v126_v61 = vadd.f32 %v1866_v56, %v101_v55  ;;  %v127_v49 = vadd.f32 %v1871_v27, %v102_v63 }
 0x108   :  { %v322_v58 = vpop.f32.mrb[0].mxu0  ;;  %v363_v59 = vpop.f32.mrb[0].mxu1 }
 0x109   :  { %v370_v60 = vadd.f32 %v322_v58, %v124_v54  ;;  %v324_v62 = vpop.f32.mrb[1].mxu0  ;;  %v365_v28 = vpop.f32.mrb[1].mxu1  ;;  %v372_v42 = vadd.f32 %v363_v59, %v126_v61 }
 0x10a   :  { %v371_v33 = vadd.f32 %v324_v62, %v125_v57  ;;  %v326_v36 = vpop.f32.mrb[2].mxu0  ;;  %v367_v37 = vpop.f32.mrb[2].mxu1  ;;  %v373_v51 = vadd.f32 %v365_v28, %v127_v49 }
 0x10b   :  { %v374_v38 = vmul.f32 0.5, %v370_v60  ;;  %v327_v39 = vpop.f32.mrb[3].mxu0  ;;  %v368_v40 = vpop.f32.mrb[3].mxu1 }
 0x10c   :  { %v378_v41 = vmul.f32 0.5, %v371_v33  ;;  %v383_v54 = vmul.f32 0.5, %v373_v51  ;;  %v1364_v39 = vld [vmem:[%s2227_s0 + $0x10] sm:$0xff]  ;;  %v1365_v40 = vld [vmem:[%s2227_s0 + $0x18] sm:$0xff]  ;;  %v397_v49 = vpop.permute.xlu0 %396 }
 0x10d   :  { %1504 = vtanh.f32 %v374_v38  ;;  %516 = vperm.xlu1 %1455, %v1364_v39   ;;  %v399_v51 = vmul.f32 %v397_v49, %v1847_v43 }
 0x10e   :  { %1506 = vtanh.f32 %v378_v41  ;;  %v1367_v41 = vld [vmem:[%s2227_s0 + $0x28] sm:$0xff] }
 0x10f   :  { %1508 = vtanh.f32 %v372_v42  ;;  %v1369_v42 = vld [vmem:[%s2227_s0 + $0x38] sm:$0xff] }
 0x110   :  { %1510 = vtanh.f32 %v383_v54  ;;  %v400_v54 = vmul.f32 %v397_v49, %v1849_v44 }
 0x111   :  { %636 = vperm.xlu1 %1455, %v1365_v40  }
 0x115   :  { %876 = vperm.xlu1 %1455, %v1367_v41  }
 0x117   :  { %v1505_v55 = vpop.eup %1504 }
 0x118   :  { %v1507_v46 = vpop.eup %1506  ;;  %v376_v45 = vmul.f32 0.5, %v1505_v55  ;;  %v403_v55 = vadd.f32 %v399_v51, %v1857_v50 }
 0x119   :  { %v380_v47 = vmul.f32 0.5, %v1507_v46  ;;  %v1509_v58 = vpop.eup %1508  ;;  %1116 = vperm.xlu1 %1455, %v1369_v42   ;;  %v401_v46 = vmul.f32 %v397_v49, %v1854_v48 }
 0x11a   :  { %v377_v57 = vadd.f32 0.5, %v376_v45  ;;  %v1511_v59 = vpop.eup %1510 }
 0x11b   :  { %v381_v62 = vadd.f32 0.5, %v380_v47  ;;  %v385_v61 = vmul.f32 0.5, %v1511_v59 }
 0x11c   :  { %v388_v60 = vmul.f32 %v1509_v58, %v377_v57  ;;  %v404_v57 = vadd.f32 %v400_v54, %v1860_v52 }
 0x11d   :  { %v387_v36 = vmul.f32 0.0, %v381_v62  ;;  %v386_v63 = vadd.f32 0.5, %v385_v61 }
 0x11f   :  { %v1874_v37 = vadd.f32 %v388_v60, %v387_v36 }
 0x121   :  { %1512 = vtanh.f32 %v1874_v37 }
 0x12b   :  { %v1513_v33 = vpop.eup %1512 }
 0x12c   :  { %v391_v28 = vmul.f32 %v1513_v33, %v386_v63  ;;  %v405_v33 = vadd.f32 %v401_v46, %v1866_v56 }
 0x12e   :  { %v407_v38 = vpack.c.bf16 %v391_v28, %v391_v28  ;;  %v402_v28 = vmul.f32 %v397_v49, %v1862_v53 }
 0x130   :  { %441 = vmatmul.mubr.bf16.vlgmr.msra.gmra.mrb[4].mxu0 %v407_v38  ;;  %482 = vmatmul.mubr.bf16.vlgmr.msra.gmra.mrb[4].mxu1 %v407_v38  ;;  %v406_v42 = vadd.f32 %v402_v28, %v1871_v27 }
 0x131   :  { %529 = vmatpush1.bf16.msra.mxu0 %v1703_v3  ;;  %570 = vmatpush1.bf16.msra.mxu1 %v1705_v4 }
 0x132   :  { %530 = vmatprep.subr.bf16.mxu0 %v1708_v5  ;;  %571 = vmatprep.subr.bf16.mxu1 %v1712_v6 }
 0x133   :  { %560 = vmatprep.mubr.bf16.mxu0 %v1643_v0  ;;  %601 = vmatprep.mubr.bf16.mxu1 %v1643_v0 }
 0x135   :  { %531 = vmatpush1.bf16.msra.mxu0 %v1714_v7  ;;  %572 = vmatpush1.bf16.msra.mxu1 %v1717_v8 }
 0x136   :  { %532 = vmatprep.subr.bf16.mxu0 %v1720_v9  ;;  %573 = vmatprep.subr.bf16.mxu1 %v1722_v10 }
 0x139   :  { %533 = vmatpush1.bf16.msra.mxu0 %v1724_v11  ;;  %574 = vmatpush1.bf16.msra.mxu1 %v1726_v12 }
 0x13a   :  { %534 = vmatprep.subr.bf16.mxu0 %v1730_v13  ;;  %575 = vmatprep.subr.bf16.mxu1 %v1734_v14 }
 0x13d   :  { %535 = vmatpush1.bf16.msra.mxu0 %v1736_v15  ;;  %576 = vmatpush1.bf16.msra.mxu1 %v1740_v16 }
 0x13e   :  { %536 = vmatprep.subr.bf16.mxu0 %v1742_v17  ;;  %577 = vmatprep.subr.bf16.mxu1 %v1746_v18 }
 0x141   :  { %537 = vmatpush1.bf16.msra.mxu0 %v1748_v19  ;;  %578 = vmatpush1.bf16.msra.mxu1 %v1750_v20 }
 0x142   :  { %538 = vmatprep.subr.bf16.mxu0 %v1754_v21  ;;  %579 = vmatprep.subr.bf16.mxu1 %v1758_v22 }
 0x145   :  { %539 = vmatpush1.bf16.msra.mxu0 %v1762_v23  ;;  %580 = vmatpush1.bf16.msra.mxu1 %v1764_v24 }
 0x146   :  { %540 = vmatprep.subr.bf16.mxu0 %v1768_v25  ;;  %581 = vmatprep.subr.bf16.mxu1 %v1770_v26 }
 0x149   :  { %541 = vmatpush1.bf16.msra.mxu0 %v1780_v29  ;;  %582 = vmatpush1.bf16.msra.mxu1 %v1782_v30 }
 0x14a   :  { %542 = vmatprep.subr.bf16.mxu0 %v1786_v31  ;;  %583 = vmatprep.subr.bf16.mxu1 %v1788_v32 }
 0x14d   :  { %543 = vmatpush1.bf16.msra.mxu0 %v1795_v34  ;;  %584 = vmatpush1.bf16.msra.mxu1 %v1797_v35 }
 0x14e   :  { %648 = vmatprep.subr.bf16.mxu0 %v1698_v1  ;;  %689 = vmatprep.subr.bf16.mxu1 %v1700_v2 }
 0x203   :  { %v442_v45 = vpop.f32.mrb[4].mxu0  ;;  %v483_v47 = vpop.f32.mrb[4].mxu1 }
 0x204   :  { %v490_v58 = vadd.f32 %v442_v45, %v403_v55  ;;  %v444_v62 = vpop.f32.mrb[5].mxu0  ;;  %v485_v60 = vpop.f32.mrb[5].mxu1  ;;  %v492_v41 = vadd.f32 %v483_v47, %v405_v33 }
 0x205   :  { %v491_v36 = vadd.f32 %v444_v62, %v404_v57  ;;  %v446_v59 = vpop.f32.mrb[6].mxu0  ;;  %v487_v61 = vpop.f32.mrb[6].mxu1  ;;  %v493_v51 = vadd.f32 %v485_v60, %v406_v42 }
 0x206   :  { %v494_v63 = vmul.f32 0.5, %v490_v58  ;;  %v447_v38 = vpop.f32.mrb[7].mxu0  ;;  %v488_v39 = vpop.f32.mrb[7].mxu1 }
 0x207   :  { %v498_v40 = vmul.f32 0.5, %v491_v36  ;;  %v503_v54 = vmul.f32 0.5, %v493_v51 }
 0x208   :  { %1514 = vtanh.f32 %v494_v63 }
 0x209   :  { %1516 = vtanh.f32 %v498_v40 }
 0x20a   :  { %1518 = vtanh.f32 %v492_v41 }
 0x20b   :  { %1520 = vtanh.f32 %v503_v54 }
 0x212   :  { %v1515_v55 = vpop.eup %1514 }
 0x213   :  { %v1517_v45 = vpop.eup %1516  ;;  %v496_v57 = vmul.f32 0.5, %v1515_v55 }
 0x214   :  { %v500_v62 = vmul.f32 0.5, %v1517_v45  ;;  %v1519_v46 = vpop.eup %1518 }
 0x215   :  { %v497_v58 = vadd.f32 0.5, %v496_v57  ;;  %v1521_v47 = vpop.eup %1520 }
 0x216   :  { %v501_v59 = vadd.f32 0.5, %v500_v62  ;;  %v505_v63 = vmul.f32 0.5, %v1521_v47 }
 0x217   :  { %v508_v49 = vmul.f32 %v1519_v46, %v497_v58 }
 0x218   :  { %v507_v61 = vmul.f32 %v501_v59, %v1874_v37  ;;  %v506_v33 = vadd.f32 0.5, %v505_v63  ;;  %v517_v37 = vpop.permute.xlu1 %516 }
 0x219   :  { %v519_v39 = vmul.f32 %v517_v37, %v1847_v43  ;;  %v520_v40 = vmul.f32 %v517_v37, %v1849_v44  ;;  %v521_v42 = vmul.f32 %v517_v37, %v1854_v48  ;;  %v522_v58 = vmul.f32 %v517_v37, %v1862_v53 }
 0x21a   :  { %v1932_v36 = vadd.f32 %v508_v49, %v507_v61 }
 0x21b   :  { %v523_v41 = vadd.f32 %v519_v39, %v1857_v50  ;;  %v524_v51 = vadd.f32 %v520_v40, %v1860_v52  ;;  %v525_v57 = vadd.f32 %v521_v42, %v1866_v56 }
 0x21c   :  { %1522 = vtanh.f32 %v1932_v36 }
 0x226   :  { %v1523_v60 = vpop.eup %1522 }
 0x227   :  { %v511_v28 = vmul.f32 %v1523_v60, %v506_v33 }
 0x229   :  { %v527_v38 = vpack.c.bf16 %v511_v28, %v511_v28 }
 0x22b   :  { %561 = vmatmul.mubr.bf16.vlgmr.msra.gmra.mrb[8].mxu0 %v527_v38  ;;  %602 = vmatmul.mubr.bf16.vlgmr.msra.gmra.mrb[8].mxu1 %v527_v38  ;;  %v526_v38 = vadd.f32 %v522_v58, %v1871_v27 }
 0x22c   :  { %649 = vmatpush1.bf16.msra.mxu0 %v1703_v3  ;;  %690 = vmatpush1.bf16.msra.mxu1 %v1705_v4 }
 0x22d   :  { %650 = vmatprep.subr.bf16.mxu0 %v1708_v5  ;;  %691 = vmatprep.subr.bf16.mxu1 %v1712_v6 }
 0x22e   :  { %680 = vmatprep.mubr.bf16.mxu0 %v1643_v0  ;;  %721 = vmatprep.mubr.bf16.mxu1 %v1643_v0 }
 0x230   :  { %651 = vmatpush1.bf16.msra.mxu0 %v1714_v7  ;;  %692 = vmatpush1.bf16.msra.mxu1 %v1717_v8 }
 0x231   :  { %652 = vmatprep.subr.bf16.mxu0 %v1720_v9  ;;  %693 = vmatprep.subr.bf16.mxu1 %v1722_v10 }
 0x234   :  { %653 = vmatpush1.bf16.msra.mxu0 %v1724_v11  ;;  %694 = vmatpush1.bf16.msra.mxu1 %v1726_v12 }
 0x235   :  { %654 = vmatprep.subr.bf16.mxu0 %v1730_v13  ;;  %695 = vmatprep.subr.bf16.mxu1 %v1734_v14 }
 0x238   :  { %655 = vmatpush1.bf16.msra.mxu0 %v1736_v15  ;;  %696 = vmatpush1.bf16.msra.mxu1 %v1740_v16 }
 0x239   :  { %656 = vmatprep.subr.bf16.mxu0 %v1742_v17  ;;  %697 = vmatprep.subr.bf16.mxu1 %v1746_v18 }
 0x23c   :  { %657 = vmatpush1.bf16.msra.mxu0 %v1748_v19  ;;  %698 = vmatpush1.bf16.msra.mxu1 %v1750_v20 }
 0x23d   :  { %658 = vmatprep.subr.bf16.mxu0 %v1754_v21  ;;  %699 = vmatprep.subr.bf16.mxu1 %v1758_v22 }
 0x240   :  { %659 = vmatpush1.bf16.msra.mxu0 %v1762_v23  ;;  %700 = vmatpush1.bf16.msra.mxu1 %v1764_v24 }
 0x241   :  { %660 = vmatprep.subr.bf16.mxu0 %v1768_v25  ;;  %701 = vmatprep.subr.bf16.mxu1 %v1770_v26 }
 0x244   :  { %661 = vmatpush1.bf16.msra.mxu0 %v1780_v29  ;;  %702 = vmatpush1.bf16.msra.mxu1 %v1782_v30 }
 0x245   :  { %662 = vmatprep.subr.bf16.mxu0 %v1786_v31  ;;  %703 = vmatprep.subr.bf16.mxu1 %v1788_v32 }
 0x248   :  { %663 = vmatpush1.bf16.msra.mxu0 %v1795_v34  ;;  %704 = vmatpush1.bf16.msra.mxu1 %v1797_v35 }
 0x249   :  { %768 = vmatprep.subr.bf16.mxu0 %v1698_v1  ;;  %809 = vmatprep.subr.bf16.mxu1 %v1700_v2 }
 0x2fe   :  { %v562_v54 = vpop.f32.mrb[8].mxu0  ;;  %v603_v55 = vpop.f32.mrb[8].mxu1 }
 0x2ff   :  { %v610_v45 = vadd.f32 %v562_v54, %v523_v41  ;;  %v564_v62 = vpop.f32.mrb[9].mxu0  ;;  %v605_v46 = vpop.f32.mrb[9].mxu1  ;;  %v612_v28 = vadd.f32 %v603_v55, %v525_v57 }
 0x300   :  { %v611_v59 = vadd.f32 %v564_v62, %v524_v51  ;;  %v566_v49 = vpop.f32.mrb[10].mxu0  ;;  %v607_v61 = vpop.f32.mrb[10].mxu1  ;;  %v613_v39 = vadd.f32 %v605_v46, %v526_v38 }
 0x301   :  { %v614_v47 = vmul.f32 0.5, %v610_v45  ;;  %v567_v63 = vpop.f32.mrb[11].mxu0  ;;  %v608_v33 = vpop.f32.mrb[11].mxu1 }
 0x302   :  { %v618_v60 = vmul.f32 0.5, %v611_v59  ;;  %v623_v40 = vmul.f32 0.5, %v613_v39 }
 0x303   :  { %1524 = vtanh.f32 %v614_v47 }
 0x304   :  { %1526 = vtanh.f32 %v618_v60 }
 0x305   :  { %1528 = vtanh.f32 %v612_v28 }
 0x306   :  { %1530 = vtanh.f32 %v623_v40 }
 0x30d   :  { %v1525_v41 = vpop.eup %1524 }
 0x30e   :  { %v1527_v42 = vpop.eup %1526  ;;  %v616_v54 = vmul.f32 0.5, %v1525_v41 }
 0x30f   :  { %v620_v37 = vmul.f32 0.5, %v1527_v42  ;;  %v1529_v62 = vpop.eup %1528 }
 0x310   :  { %v617_v51 = vadd.f32 0.5, %v616_v54  ;;  %v1531_v55 = vpop.eup %1530 }
 0x311   :  { %v621_v49 = vadd.f32 0.5, %v620_v37  ;;  %v625_v57 = vmul.f32 0.5, %v1531_v55 }
 0x312   :  { %v628_v45 = vmul.f32 %v1529_v62, %v617_v51 }
 0x313   :  { %v627_v61 = vmul.f32 %v621_v49, %v1932_v36  ;;  %v626_v58 = vadd.f32 0.5, %v625_v57  ;;  %v637_v36 = vpop.permute.xlu1 %636 }
 0x314   :  { %v639_v33 = vmul.f32 %v637_v36, %v1847_v43  ;;  %v640_v60 = vmul.f32 %v637_v36, %v1849_v44  ;;  %v641_v38 = vmul.f32 %v637_v36, %v1854_v48  ;;  %v642_v55 = vmul.f32 %v637_v36, %v1862_v53 }
 0x315   :  { %v1978_v59 = vadd.f32 %v628_v45, %v627_v61 }
 0x316   :  { %v643_v28 = vadd.f32 %v639_v33, %v1857_v50  ;;  %v644_v41 = vadd.f32 %v640_v60, %v1860_v52  ;;  %v645_v61 = vadd.f32 %v641_v38, %v1866_v56 }
 0x317   :  { %1532 = vtanh.f32 %v1978_v59 }
 0x321   :  { %v1533_v46 = vpop.eup %1532 }
 0x322   :  { %v631_v47 = vmul.f32 %v1533_v46, %v626_v58 }
 0x324   :  { %v647_v63 = vpack.c.bf16 %v631_v47, %v631_v47 }
 0x326   :  { %681 = vmatmul.mubr.bf16.vlgmr.msra.gmra.mrb[12].mxu0 %v647_v63  ;;  %722 = vmatmul.mubr.bf16.vlgmr.msra.gmra.mrb[12].mxu1 %v647_v63  ;;  %v646_v63 = vadd.f32 %v642_v55, %v1871_v27 }
 0x327   :  { %769 = vmatpush1.bf16.msra.mxu0 %v1703_v3  ;;  %810 = vmatpush1.bf16.msra.mxu1 %v1705_v4 }
 0x328   :  { %770 = vmatprep.subr.bf16.mxu0 %v1708_v5  ;;  %811 = vmatprep.subr.bf16.mxu1 %v1712_v6 }
 0x329   :  { %800 = vmatprep.mubr.bf16.mxu0 %v1643_v0  ;;  %841 = vmatprep.mubr.bf16.mxu1 %v1643_v0 }
 0x32b   :  { %771 = vmatpush1.bf16.msra.mxu0 %v1714_v7  ;;  %812 = vmatpush1.bf16.msra.mxu1 %v1717_v8 }
 0x32c   :  { %772 = vmatprep.subr.bf16.mxu0 %v1720_v9  ;;  %813 = vmatprep.subr.bf16.mxu1 %v1722_v10 }
 0x32f   :  { %773 = vmatpush1.bf16.msra.mxu0 %v1724_v11  ;;  %814 = vmatpush1.bf16.msra.mxu1 %v1726_v12 }
 0x330   :  { %774 = vmatprep.subr.bf16.mxu0 %v1730_v13  ;;  %815 = vmatprep.subr.bf16.mxu1 %v1734_v14 }
 0x333   :  { %775 = vmatpush1.bf16.msra.mxu0 %v1736_v15  ;;  %816 = vmatpush1.bf16.msra.mxu1 %v1740_v16 }
 0x334   :  { %776 = vmatprep.subr.bf16.mxu0 %v1742_v17  ;;  %817 = vmatprep.subr.bf16.mxu1 %v1746_v18 }
 0x337   :  { %777 = vmatpush1.bf16.msra.mxu0 %v1748_v19  ;;  %818 = vmatpush1.bf16.msra.mxu1 %v1750_v20 }
 0x338   :  { %778 = vmatprep.subr.bf16.mxu0 %v1754_v21  ;;  %819 = vmatprep.subr.bf16.mxu1 %v1758_v22 }
 0x33b   :  { %779 = vmatpush1.bf16.msra.mxu0 %v1762_v23  ;;  %820 = vmatpush1.bf16.msra.mxu1 %v1764_v24 }
 0x33c   :  { %780 = vmatprep.subr.bf16.mxu0 %v1768_v25  ;;  %821 = vmatprep.subr.bf16.mxu1 %v1770_v26 }
 0x33f   :  { %781 = vmatpush1.bf16.msra.mxu0 %v1780_v29  ;;  %822 = vmatpush1.bf16.msra.mxu1 %v1782_v30 }
 0x340   :  { %782 = vmatprep.subr.bf16.mxu0 %v1786_v31  ;;  %823 = vmatprep.subr.bf16.mxu1 %v1788_v32 }
 0x343   :  { %783 = vmatpush1.bf16.msra.mxu0 %v1795_v34  ;;  %824 = vmatpush1.bf16.msra.mxu1 %v1797_v35 }
 0x344   :  { %888 = vmatprep.subr.bf16.mxu0 %v1698_v1  ;;  %929 = vmatprep.subr.bf16.mxu1 %v1700_v2 }
 0x3f9   :  { %v682_v39 = vpop.f32.mrb[12].mxu0  ;;  %v723_v40 = vpop.f32.mrb[12].mxu1 }
 0x3fa   :  { %v730_v42 = vadd.f32 %v682_v39, %v643_v28  ;;  %v684_v54 = vpop.f32.mrb[13].mxu0  ;;  %v725_v37 = vpop.f32.mrb[13].mxu1  ;;  %v732_v47 = vadd.f32 %v723_v40, %v645_v61 }
 0x3fb   :  { %v731_v51 = vadd.f32 %v684_v54, %v644_v41  ;;  %v686_v62 = vpop.f32.mrb[14].mxu0  ;;  %v727_v49 = vpop.f32.mrb[14].mxu1  ;;  %v733_v33 = vadd.f32 %v725_v37, %v646_v63 }
 0x3fc   :  { %v734_v45 = vmul.f32 0.5, %v730_v42  ;;  %v687_v57 = vpop.f32.mrb[15].mxu0  ;;  %v728_v58 = vpop.f32.mrb[15].mxu1 }
 0x3fd   :  { %v738_v46 = vmul.f32 0.5, %v731_v51  ;;  %v743_v60 = vmul.f32 0.5, %v733_v33 }
 0x3fe   :  { %1534 = vtanh.f32 %v734_v45 }
 0x3ff   :  { %1536 = vtanh.f32 %v738_v46 }
 0x400   :  { %1538 = vtanh.f32 %v732_v47 }
 0x401   :  { %1540 = vtanh.f32 %v743_v60 }
 0x408   :  { %v1535_v28 = vpop.eup %1534 }
 0x409   :  { %v1537_v39 = vpop.eup %1536  ;;  %v736_v41 = vmul.f32 0.5, %v1535_v28 }
 0x40a   :  { %v740_v54 = vmul.f32 0.5, %v1537_v39  ;;  %v1539_v38 = vpop.eup %1538 }
 0x40b   :  { %v737_v42 = vadd.f32 0.5, %v736_v41  ;;  %v1541_v40 = vpop.eup %1540 }
 0x40c   :  { %v741_v62 = vadd.f32 0.5, %v740_v54  ;;  %v745_v45 = vmul.f32 0.5, %v1541_v40 }
 0x40d   :  { %v748_v36 = vmul.f32 %v1539_v38, %v737_v42 }
 0x40e   :  { %v747_v49 = vmul.f32 %v741_v62, %v1978_v59  ;;  %v746_v61 = vadd.f32 0.5, %v745_v45 }
 0x410   :  { %v2024_v51 = vadd.f32 %v748_v36, %v747_v49 }
 0x412   :  { %1542 = vtanh.f32 %v2024_v51 }
 0x41c   :  { %v1543_v37 = vpop.eup %1542 }
 0x41d   :  { %v751_v55 = vmul.f32 %v1543_v37, %v746_v61 }
 0x41f   :  { %v767_v57 = vpack.c.bf16 %v751_v55, %v751_v55 }
 0x421   :  { %801 = vmatmul.mubr.bf16.vlgmr.msra.gmra.mrb[16].mxu0 %v767_v57  ;;  %842 = vmatmul.mubr.bf16.vlgmr.msra.gmra.mrb[16].mxu1 %v767_v57 }
 0x422   :  { %889 = vmatpush1.bf16.msra.mxu0 %v1703_v3  ;;  %930 = vmatpush1.bf16.msra.mxu1 %v1705_v4  ;;  %v757_v3 = vpop.permute.xlu0 %756 }
 0x423   :  { %890 = vmatprep.subr.bf16.mxu0 %v1708_v5  ;;  %931 = vmatprep.subr.bf16.mxu1 %v1712_v6  ;;  %v759_v4 = vmul.f32 %v757_v3, %v1847_v43  ;;  %v760_v5 = vmul.f32 %v757_v3, %v1849_v44  ;;  %v762_v47 = vmul.f32 %v757_v3, %v1862_v53 }
 0x424   :  { %920 = vmatprep.mubr.bf16.mxu0 %v1643_v0  ;;  %961 = vmatprep.mubr.bf16.mxu1 %v1643_v0 }
 0x425   :  { %v763_v6 = vadd.f32 %v759_v4, %v1857_v50  ;;  %v766_v39 = vadd.f32 %v762_v47, %v1871_v27 }
 0x426   :  { %891 = vmatpush1.bf16.msra.mxu0 %v1714_v7  ;;  %932 = vmatpush1.bf16.msra.mxu1 %v1717_v8  ;;  %v761_v7 = vmul.f32 %v757_v3, %v1854_v48 }
 0x427   :  { %892 = vmatprep.subr.bf16.mxu0 %v1720_v9  ;;  %933 = vmatprep.subr.bf16.mxu1 %v1722_v10  ;;  %v764_v10 = vadd.f32 %v760_v5, %v1860_v52 }
 0x428   :  { %v765_v46 = vadd.f32 %v761_v7, %v1866_v56 }
 0x42a   :  { %893 = vmatpush1.bf16.msra.mxu0 %v1724_v11  ;;  %934 = vmatpush1.bf16.msra.mxu1 %v1726_v12 }
 0x42b   :  { %894 = vmatprep.subr.bf16.mxu0 %v1730_v13  ;;  %935 = vmatprep.subr.bf16.mxu1 %v1734_v14 }
 0x42e   :  { %895 = vmatpush1.bf16.msra.mxu0 %v1736_v15  ;;  %936 = vmatpush1.bf16.msra.mxu1 %v1740_v16 }
 0x42f   :  { %896 = vmatprep.subr.bf16.mxu0 %v1742_v17  ;;  %937 = vmatprep.subr.bf16.mxu1 %v1746_v18 }
 0x432   :  { %897 = vmatpush1.bf16.msra.mxu0 %v1748_v19  ;;  %938 = vmatpush1.bf16.msra.mxu1 %v1750_v20 }
 0x433   :  { %898 = vmatprep.subr.bf16.mxu0 %v1754_v21  ;;  %939 = vmatprep.subr.bf16.mxu1 %v1758_v22 }
 0x436   :  { %899 = vmatpush1.bf16.msra.mxu0 %v1762_v23  ;;  %940 = vmatpush1.bf16.msra.mxu1 %v1764_v24 }
 0x437   :  { %900 = vmatprep.subr.bf16.mxu0 %v1768_v25  ;;  %941 = vmatprep.subr.bf16.mxu1 %v1770_v26 }
 0x43a   :  { %901 = vmatpush1.bf16.msra.mxu0 %v1780_v29  ;;  %942 = vmatpush1.bf16.msra.mxu1 %v1782_v30 }
 0x43b   :  { %902 = vmatprep.subr.bf16.mxu0 %v1786_v31  ;;  %943 = vmatprep.subr.bf16.mxu1 %v1788_v32 }
 0x43e   :  { %903 = vmatpush1.bf16.msra.mxu0 %v1795_v34  ;;  %944 = vmatpush1.bf16.msra.mxu1 %v1797_v35 }
 0x43f   :  { %1008 = vmatprep.subr.bf16.mxu0 %v1698_v1  ;;  %1049 = vmatprep.subr.bf16.mxu1 %v1700_v2 }
 0x4f4   :  { %v802_v8 = vpop.f32.mrb[16].mxu0  ;;  %v843_v9 = vpop.f32.mrb[16].mxu1 }
 0x4f5   :  { %v850_v11 = vadd.f32 %v802_v8, %v763_v6  ;;  %v804_v12 = vpop.f32.mrb[17].mxu0  ;;  %v845_v13 = vpop.f32.mrb[17].mxu1  ;;  %v852_v28 = vadd.f32 %v843_v9, %v765_v46  ;;  %v2073_v8 = vld [vmem:[#allocation2] ss:$16 sps:$4 sm:$0xff]   ;;  %v2076_v9 = vld [vmem:[#allocation2 + $0x8] ss:$16 sps:$4 sm:$0xff]  }
 0x4f6   :  { %v851_v59 = vadd.f32 %v804_v12, %v764_v10  ;;  %v806_v1 = vpop.f32.mrb[18].mxu0  ;;  %v847_v58 = vpop.f32.mrb[18].mxu1  ;;  %v853_v41 = vadd.f32 %v845_v13, %v766_v39  ;;  %v2082_v10 = vld [vmem:[#allocation2 + $0x2c] ss:$16 sps:$4 sm:$0xff]   ;;  %v2090_v12 = vld [vmem:[#allocation2 + $0x28] ss:$16 sps:$4 sm:$0xff]  }
 0x4f7   :  { %v854_v2 = vmul.f32 0.5, %v850_v11  ;;  %v807_v63 = vpop.f32.mrb[19].mxu0  ;;  %v848_v33 = vpop.f32.mrb[19].mxu1  ;;  %v2087_v11 = vld [vmem:[#allocation2 + $0x20] ss:$16 sps:$4 sm:$0xff]  }
 0x4f8   :  { %v858_v60 = vmul.f32 0.5, %v851_v59  ;;  %v863_v54 = vmul.f32 0.5, %v853_v41  ;;  %v2093_v13 = vld [vmem:[#allocation2 + $0x44] ss:$16 sps:$4 sm:$0xff]   ;;  %v2096_v59 = vld [vmem:[#allocation2 + $0x4c] ss:$16 sps:$4 sm:$0xff]  }
 0x4f9   :  { %1544 = vtanh.f32 %v854_v2  ;;  %v2099_v1 = vld [vmem:[#allocation2 + $0x40] ss:$16 sps:$4 sm:$0xff]   ;;  %v2102_v58 = vld [vmem:[#allocation2 + $0x48] ss:$16 sps:$4 sm:$0xff]   ;;  %v2105_v2 = vld [vmem:[#allocation2 + $0x64] ss:$16 sps:$4 sm:$0xff]  }
 0x4fa   :  { %1546 = vtanh.f32 %v858_v60 }
 0x4fb   :  { %1548 = vtanh.f32 %v852_v28 }
 0x4fc   :  { %1550 = vtanh.f32 %v863_v54 }
 0x503   :  { %v1545_v42 = vpop.eup %1544 }
 0x504   :  { %v1547_v38 = vpop.eup %1546  ;;  %v856_v62 = vmul.f32 0.5, %v1545_v42 }
 0x505   :  { %v860_v36 = vmul.f32 0.5, %v1547_v38  ;;  %v1549_v40 = vpop.eup %1548 }
 0x506   :  { %v857_v49 = vadd.f32 0.5, %v856_v62  ;;  %v1551_v57 = vpop.eup %1550 }
 0x507   :  { %v861_v45 = vadd.f32 0.5, %v860_v36  ;;  %v865_v3 = vmul.f32 0.5, %v1551_v57 }
 0x508   :  { %v868_v61 = vmul.f32 %v1549_v40, %v857_v49 }
 0x509   :  { %v867_v37 = vmul.f32 %v861_v45, %v2024_v51  ;;  %v866_v4 = vadd.f32 0.5, %v865_v3  ;;  %v2079_v51 = vld [vmem:[#allocation2 + $0x24] ss:$16 sps:$4 sm:$0xff]  }
 0x50b   :  { %v2070_v55 = vadd.f32 %v868_v61, %v867_v37 }
 0x50d   :  { %1552 = vtanh.f32 %v2070_v55 }
 0x517   :  { %v1553_v5 = vpop.eup %1552 }
 0x518   :  { %v871_v6 = vmul.f32 %v1553_v5, %v866_v4 }
 0x51a   :  { %v887_v7 = vpack.c.bf16 %v871_v6, %v871_v6 }
 0x51c   :  { %921 = vmatmul.mubr.bf16.vlgmr.msra.gmra.mrb[20].mxu0 %v887_v7  ;;  %962 = vmatmul.mubr.bf16.vlgmr.msra.gmra.mrb[20].mxu1 %v887_v7  ;;  %v1598_v7 = vld [vmem:[#allocation2 + $0x60] ss:$16 sps:$4 sm:$0xff]  }
 0x51d   :  { %1009 = vmatpush1.bf16.msra.mxu0 %v2073_v8  ;;  %1050 = vmatpush1.bf16.msra.mxu1 %v2076_v9 }
 0x51e   :  { %1010 = vmatprep.subr.bf16.mxu0 %v2079_v51  ;;  %1051 = vmatprep.subr.bf16.mxu1 %v2082_v10 }
 0x51f   :  { %1040 = vmatprep.mubr.bf16.mxu0 %v1643_v0  ;;  %1081 = vmatprep.mubr.bf16.mxu1 %v1643_v0 }
 0x521   :  { %1011 = vmatpush1.bf16.msra.mxu0 %v2087_v11  ;;  %1052 = vmatpush1.bf16.msra.mxu1 %v2090_v12 }
 0x522   :  { %1012 = vmatprep.subr.bf16.mxu0 %v2093_v13  ;;  %1053 = vmatprep.subr.bf16.mxu1 %v2096_v59 }
 0x525   :  { %1013 = vmatpush1.bf16.msra.mxu0 %v2099_v1  ;;  %1054 = vmatpush1.bf16.msra.mxu1 %v2102_v58 }
 0x526   :  { %1014 = vmatprep.subr.bf16.mxu0 %v2105_v2  ;;  %1055 = vmatprep.subr.bf16.mxu1 %v1734_v14  ;;  %v1595_v14 = vld [vmem:[#allocation2 + $0x4] ss:$16 sps:$4 sm:$0xff]  }
 0x529   :  { %1015 = vmatpush1.bf16.msra.mxu0 %v1736_v15  ;;  %1056 = vmatpush1.bf16.msra.mxu1 %v1740_v16  ;;  %v1596_v15 = vld [vmem:[#allocation2 + $0xc] ss:$16 sps:$4 sm:$0xff]   ;;  %v877_v16 = vpop.permute.xlu1 %876 }
 0x52a   :  { %1016 = vmatprep.subr.bf16.mxu0 %v1742_v17  ;;  %1057 = vmatprep.subr.bf16.mxu1 %v1746_v18  ;;  %v879_v17 = vmul.f32 %v877_v16, %v1847_v43  ;;  %v880_v18 = vmul.f32 %v877_v16, %v1849_v44 }
 0x52d   :  { %1017 = vmatpush1.bf16.msra.mxu0 %v1748_v19  ;;  %1058 = vmatpush1.bf16.msra.mxu1 %v1750_v20  ;;  %v883_v19 = vadd.f32 %v879_v17, %v1857_v50  ;;  %v881_v20 = vmul.f32 %v877_v16, %v1854_v48  ;;  %v1614_v17 = vld [vmem:[#allocation2 + $0xe0] ss:$16 sps:$4 sm:$0xff]  }
 0x52e   :  { %1018 = vmatprep.subr.bf16.mxu0 %v1754_v21  ;;  %1059 = vmatprep.subr.bf16.mxu1 %v1758_v22 }
 0x531   :  { %1019 = vmatpush1.bf16.msra.mxu0 %v1762_v23  ;;  %1060 = vmatpush1.bf16.msra.mxu1 %v1764_v24  ;;  %v884_v23 = vadd.f32 %v880_v18, %v1860_v52  ;;  %v1615_v18 = vld [vmem:[#allocation2 + $0xe8] ss:$16 sps:$4 sm:$0xff]  }
 0x532   :  { %1020 = vmatprep.subr.bf16.mxu0 %v1768_v25  ;;  %1061 = vmatprep.subr.bf16.mxu1 %v1770_v26 }
 0x535   :  { %1021 = vmatpush1.bf16.msra.mxu0 %v1780_v29  ;;  %1062 = vmatpush1.bf16.msra.mxu1 %v1782_v30 }
 0x536   :  { %1022 = vmatprep.subr.bf16.mxu0 %v1786_v31  ;;  %1063 = vmatprep.subr.bf16.mxu1 %v1788_v32 }
 0x539   :  { %1023 = vmatpush1.bf16.msra.mxu0 %v1795_v34  ;;  %1064 = vmatpush1.bf16.msra.mxu1 %v1797_v35  ;;  %v885_v34 = vadd.f32 %v881_v20, %v1866_v56  ;;  %v882_v35 = vmul.f32 %v877_v16, %v1862_v53  ;;  %v1613_v16 = vld [vmem:[#allocation2 + $0xec] ss:$16 sps:$4 sm:$0xff]  }
 0x53a   :  { %1128 = vmatprep.subr.bf16.mxu0 %v1595_v14  ;;  %1169 = vmatprep.subr.bf16.mxu1 %v1596_v15  ;;  %v1611_v14 = vld [vmem:[#allocation2 + $0xc8] ss:$16 sps:$4 sm:$0xff]   ;;  %v1612_v15 = vld [vmem:[#allocation2 + $0xe4] ss:$16 sps:$4 sm:$0xff]  }
 0x53b   :  { %v886_v60 = vadd.f32 %v882_v35, %v1871_v27 }
 0x5ef   :  { %v922_v21 = vpop.f32.mrb[20].mxu0  ;;  %v963_v22 = vpop.f32.mrb[20].mxu1 }
 0x5f0   :  { %v970_v24 = vadd.f32 %v922_v21, %v883_v19  ;;  %v924_v25 = vpop.f32.mrb[21].mxu0  ;;  %v965_v26 = vpop.f32.mrb[21].mxu1  ;;  %v972_v33 = vadd.f32 %v963_v22, %v885_v34 }
 0x5f1   :  { %v971_v29 = vadd.f32 %v924_v25, %v884_v23  ;;  %v926_v30 = vpop.f32.mrb[22].mxu0  ;;  %v967_v31 = vpop.f32.mrb[22].mxu1  ;;  %v973_v28 = vadd.f32 %v965_v26, %v886_v60 }
 0x5f2   :  { %v974_v32 = vmul.f32 0.5, %v970_v24  ;;  %v927_v46 = vpop.f32.mrb[23].mxu0  ;;  %v968_v47 = vpop.f32.mrb[23].mxu1 }
 0x5f3   :  { %v978_v63 = vmul.f32 0.5, %v971_v29  ;;  %v983_v39 = vmul.f32 0.5, %v973_v28  ;;  %v997_v19 = vpop.permute.xlu0 %996 }
 0x5f4   :  { %1554 = vtanh.f32 %v974_v32  ;;  %v999_v20 = vmul.f32 %v997_v19, %v1847_v43  ;;  %v1000_v21 = vmul.f32 %v997_v19, %v1849_v44  ;;  %v1001_v22 = vmul.f32 %v997_v19, %v1854_v48 }
 0x5f5   :  { %1556 = vtanh.f32 %v978_v63  ;;  %v1002_v46 = vmul.f32 %v997_v19, %v1862_v53  ;;  %v1242_v19 = vld [vmem:[%s2231_s4 + $0x50] sm:$0xff] }
 0x5f6   :  { %1558 = vtanh.f32 %v972_v33  ;;  %v1003_v23 = vadd.f32 %v999_v20, %v1857_v50  ;;  %v1004_v26 = vadd.f32 %v1000_v21, %v1860_v52  ;;  %v1005_v63 = vadd.f32 %v1001_v22, %v1866_v56  ;;  %v1243_v20 = vld [vmem:[%s2231_s4 + $0x58] sm:$0xff]  ;;  %v1244_v22 = vld [vmem:[%s2231_s4 + $0x60] sm:$0xff] }
 0x5f7   :  { %1560 = vtanh.f32 %v983_v39  ;;  %v1439_v21 = vpack.c.bf16 %v1243_v20, %v1242_v19 }
 0x5fe   :  { %v1555_v41 = vpop.eup %1554 }
 0x5ff   :  { %v1557_v54 = vpop.eup %1556  ;;  %v976_v42 = vmul.f32 0.5, %v1555_v41  ;;  %v1006_v41 = vadd.f32 %v1002_v46, %v1871_v27 }
 0x600   :  { %v980_v38 = vmul.f32 0.5, %v1557_v54  ;;  %v1559_v36 = vpop.eup %1558 }
 0x601   :  { %v977_v62 = vadd.f32 0.5, %v976_v42  ;;  %v1561_v37 = vpop.eup %1560 }
 0x602   :  { %v981_v49 = vadd.f32 0.5, %v980_v38  ;;  %v985_v57 = vmul.f32 0.5, %v1561_v37 }
 0x603   :  { %v988_v40 = vmul.f32 %v1559_v36, %v977_v62 }
 0x604   :  { %v987_v45 = vmul.f32 %v981_v49, %v2070_v55  ;;  %v986_v3 = vadd.f32 0.5, %v985_v57  ;;  %v1597_v55 = vld [vmem:[#allocation2 + $0x6c] ss:$16 sps:$4 sm:$0xff]  }
 0x606   :  { %v2136_v61 = vadd.f32 %v988_v40, %v987_v45 }
 0x608   :  { %1562 = vtanh.f32 %v2136_v61 }
 0x612   :  { %v1563_v4 = vpop.eup %1562 }
 0x613   :  { %v991_v5 = vmul.f32 %v1563_v4, %v986_v3 }
 0x615   :  { %v1007_v6 = vpack.c.bf16 %v991_v5, %v991_v5 }
 0x617   :  { %1041 = vmatmul.mubr.bf16.vlgmr.msra.gmra.mrb[24].mxu0 %v1007_v6  ;;  %1082 = vmatmul.mubr.bf16.vlgmr.msra.gmra.mrb[24].mxu1 %v1007_v6 }
 0x618   :  { %1129 = vmatpush1.bf16.msra.mxu0 %v2073_v8  ;;  %1170 = vmatpush1.bf16.msra.mxu1 %v2076_v9  ;;  %v1599_v8 = vld [vmem:[#allocation2 + $0x68] ss:$16 sps:$4 sm:$0xff]   ;;  %v1601_v9 = vld [vmem:[#allocation2 + $0x8c] ss:$16 sps:$4 sm:$0xff]  }
 0x619   :  { %1130 = vmatprep.subr.bf16.mxu0 %v2079_v51  ;;  %1171 = vmatprep.subr.bf16.mxu1 %v2082_v10  ;;  %v1602_v51 = vld [vmem:[#allocation2 + $0x80] ss:$16 sps:$4 sm:$0xff]   ;;  %v1603_v10 = vld [vmem:[#allocation2 + $0x88] ss:$16 sps:$4 sm:$0xff]  }
 0x61a   :  { %1160 = vmatprep.mubr.bf16.mxu0 %v1643_v0  ;;  %1201 = vmatprep.mubr.bf16.mxu1 %v1643_v0  ;;  %v1600_v0 = vld [vmem:[#allocation2 + $0x84] ss:$16 sps:$4 sm:$0xff]  }
 0x61c   :  { %1131 = vmatpush1.bf16.msra.mxu0 %v2087_v11  ;;  %1172 = vmatpush1.bf16.msra.mxu1 %v2090_v12  ;;  %v1604_v11 = vld [vmem:[#allocation2 + $0xa4] ss:$16 sps:$4 sm:$0xff]   ;;  %v1605_v12 = vld [vmem:[#allocation2 + $0xac] ss:$16 sps:$4 sm:$0xff]  }
 0x61d   :  { %1132 = vmatprep.subr.bf16.mxu0 %v2093_v13  ;;  %1173 = vmatprep.subr.bf16.mxu1 %v2096_v59  ;;  %v1606_v13 = vld [vmem:[#allocation2 + $0xa0] ss:$16 sps:$4 sm:$0xff]   ;;  %v1607_v59 = vld [vmem:[#allocation2 + $0xa8] ss:$16 sps:$4 sm:$0xff]  }
 0x620   :  { %1133 = vmatpush1.bf16.msra.mxu0 %v2099_v1  ;;  %1174 = vmatpush1.bf16.msra.mxu1 %v2102_v58  ;;  %v1608_v1 = vld [vmem:[#allocation2 + $0xc4] ss:$16 sps:$4 sm:$0xff]   ;;  %v1609_v58 = vld [vmem:[#allocation2 + $0xcc] ss:$16 sps:$4 sm:$0xff]  }
 0x621   :  { %1134 = vmatprep.subr.bf16.mxu0 %v2105_v2  ;;  %1175 = vmatprep.subr.bf16.mxu1 %v1597_v55  ;;  %v1610_v2 = vld [vmem:[#allocation2 + $0xc0] ss:$16 sps:$4 sm:$0xff]  }
 0x624   :  { %1135 = vmatpush1.bf16.msra.mxu0 %v1598_v7  ;;  %1176 = vmatpush1.bf16.msra.mxu1 %v1599_v8 }
 0x625   :  { %1136 = vmatprep.subr.bf16.mxu0 %v1600_v0  ;;  %1177 = vmatprep.subr.bf16.mxu1 %v1601_v9  ;;  %v1232_v9 = vld [vmem:[%s2231_s4] sm:$0xff] }
 0x628   :  { %1137 = vmatpush1.bf16.msra.mxu0 %v1602_v51  ;;  %1178 = vmatpush1.bf16.msra.mxu1 %v1603_v10  ;;  %v1644_v10 = vmov 0.0|0.0  }
 0x629   :  { %1138 = vmatprep.subr.bf16.mxu0 %v1604_v11  ;;  %1179 = vmatprep.subr.bf16.mxu1 %v1605_v12  ;;  %v1234_v11 = vld [vmem:[%s2231_s4 + $0x10] sm:$0xff]  ;;  %v1235_v12 = vld [vmem:[%s2231_s4 + $0x18] sm:$0xff] }
 0x62c   :  { %1139 = vmatpush1.bf16.msra.mxu0 %v1606_v13  ;;  %1180 = vmatpush1.bf16.msra.mxu1 %v1607_v59  ;;  %v1427_v13 = vpack.c.bf16 %v1235_v12, %v1234_v11  ;;  %v1236_v59 = vld [vmem:[%s2231_s4 + $0x20] sm:$0xff] }
 0x62d   :  { %1140 = vmatprep.subr.bf16.mxu0 %v1608_v1  ;;  %1181 = vmatprep.subr.bf16.mxu1 %v1609_v58  ;;  %v1237_v1 = vld [vmem:[%s2231_s4 + $0x28] sm:$0xff] }
 0x62e   :  { %v1430_v58 = vpack.c.bf16 %v1237_v1, %v1236_v59 }
 0x630   :  { %1141 = vmatpush1.bf16.msra.mxu0 %v1610_v2  ;;  %1182 = vmatpush1.bf16.msra.mxu1 %v1611_v14  ;;  %v1238_v2 = vld [vmem:[%s2231_s4 + $0x30] sm:$0xff]  ;;  %v1239_v14 = vld [vmem:[%s2231_s4 + $0x38] sm:$0xff] }
 0x631   :  { %1142 = vmatprep.subr.bf16.mxu0 %v1612_v15  ;;  %1183 = vmatprep.subr.bf16.mxu1 %v1613_v16  ;;  %v1433_v15 = vpack.c.bf16 %v1239_v14, %v1238_v2  ;;  %v1240_v16 = vld [vmem:[%s2231_s4 + $0x40] sm:$0xff] }
 0x634   :  { %1143 = vmatpush1.bf16.msra.mxu0 %v1614_v17  ;;  %1184 = vmatpush1.bf16.msra.mxu1 %v1615_v18  ;;  %v1241_v17 = vld [vmem:[%s2231_s4 + $0x48] sm:$0xff] }
 0x635   :  { %1423 = vmatprep.subr.bf16.mxu0 %v1644_v10  ;;  %v1436_v18 = vpack.c.bf16 %v1241_v17, %v1240_v16 }
 0x6ea   :  { %v1042_v24 = vpop.f32.mrb[24].mxu0  ;;  %v1083_v25 = vpop.f32.mrb[24].mxu1 }
 0x6eb   :  { %v1090_v29 = vadd.f32 %v1042_v24, %v1003_v23  ;;  %v1044_v30 = vpop.f32.mrb[25].mxu0  ;;  %v1085_v31 = vpop.f32.mrb[25].mxu1  ;;  %v1092_v39 = vadd.f32 %v1083_v25, %v1005_v63  ;;  %v1245_v23 = vld [vmem:[%s2231_s4 + $0x68] sm:$0xff]  ;;  %v1246_v25 = vld [vmem:[%s2231_s4 + $0x70] sm:$0xff] }
 0x6ec   :  { %v1091_v32 = vadd.f32 %v1044_v30, %v1004_v26  ;;  %v1046_v34 = vpop.f32.mrb[26].mxu0  ;;  %v1087_v35 = vpop.f32.mrb[26].mxu1  ;;  %v1093_v54 = vadd.f32 %v1085_v31, %v1006_v41  ;;  %v1442_v24 = vpack.c.bf16 %v1245_v23, %v1244_v22  ;;  %v1247_v26 = vld [vmem:[%s2231_s4 + $0x78] sm:$0xff]  ;;  %v1646_v30 = vmov 0.0  }
 0x6ed   :  { %v1094_v47 = vmul.f32 0.5, %v1090_v29  ;;  %v1047_v33 = vpop.f32.mrb[27].mxu0  ;;  %v1088_v60 = vpop.f32.mrb[27].mxu1  ;;  %v1445_v29 = vpack.c.bf16 %v1247_v26, %v1246_v25 }
 0x6ee   :  { %v1098_v28 = vmul.f32 0.5, %v1091_v32  ;;  %v1103_v42 = vmul.f32 0.5, %v1093_v54  ;;  %v1117_v31 = vpop.permute.xlu1 %1116 }
 0x6ef   :  { %1564 = vtanh.f32 %v1094_v47  ;;  %v1119_v32 = vmul.f32 %v1117_v31, %v1847_v43  ;;  %v1120_v34 = vmul.f32 %v1117_v31, %v1849_v44  ;;  %v1121_v35 = vmul.f32 %v1117_v31, %v1854_v48 }
 0x6f0   :  { %1566 = vtanh.f32 %v1098_v28 }
 0x6f1   :  { %1568 = vtanh.f32 %v1092_v39  ;;  %v1123_v46 = vadd.f32 %v1119_v32, %v1857_v50  ;;  %v1124_v33 = vadd.f32 %v1120_v34, %v1860_v52  ;;  %v1125_v43 = vadd.f32 %v1121_v35, %v1866_v56 }
 0x6f2   :  { %1570 = vtanh.f32 %v1103_v42 }
 0x6f9   :  { %v1565_v38 = vpop.eup %1564 }
 0x6fa   :  { %v1567_v62 = vpop.eup %1566  ;;  %v1096_v36 = vmul.f32 0.5, %v1565_v38  ;;  %v1122_v38 = vmul.f32 %v1117_v31, %v1862_v53 }
 0x6fb   :  { %v1100_v49 = vmul.f32 0.5, %v1567_v62  ;;  %v1569_v45 = vpop.eup %1568 }
 0x6fc   :  { %v1097_v40 = vadd.f32 0.5, %v1096_v36  ;;  %v1571_v5 = vpop.eup %1570 }
 0x6fd   :  { %v1101_v37 = vadd.f32 0.5, %v1100_v49  ;;  %v1105_v6 = vmul.f32 0.5, %v1571_v5  ;;  %v1126_v49 = vadd.f32 %v1122_v38, %v1871_v27 }
 0x6fe   :  { %v1108_v57 = vmul.f32 %v1569_v45, %v1097_v40 }
 0x6ff   :  { %v1107_v3 = vmul.f32 %v1101_v37, %v2136_v61  ;;  %v1106_v55 = vadd.f32 0.5, %v1105_v6  ;;  %v1233_v61 = vld [vmem:[%s2231_s4 + $0x8] sm:$0xff] }
 0x700   :  { %v1424_v51 = vpack.c.bf16 %v1233_v61, %v1232_v9 }
 0x701   :  { %v2161_v4 = vadd.f32 %v1108_v57, %v1107_v3 }
 0x703   :  { %1572 = vtanh.f32 %v2161_v4 }
 0x70d   :  { %v1573_v7 = vpop.eup %1572 }
 0x70e   :  { %v1111_v8 = vmul.f32 %v1573_v7, %v1106_v55 }
 0x710   :  { %v1127_v0 = vpack.c.bf16 %v1111_v8, %v1111_v8 }
 0x712   :  { %1161 = vmatmul.mubr.bf16.vlgmr.msra.gmra.mrb[28].mxu0 %v1127_v0  ;;  %1202 = vmatmul.mubr.bf16.vlgmr.msra.gmra.mrb[28].mxu1 %v1127_v0 }
 0x713   :  { %1425 = vmatpush3.bf16.msra.mxu0 %v1424_v51  ;;  %1420 = vmatprep.mubr.msk.f32.mxu0 %vm1645_vm0, %v1646_v30  ;;  %v1370_v51 = vld [vmem:[%s2232_s5] ss:$0 sm:$0xff] }
 0x714   :  { %1426 = vmatprep.subr.bf16.mxu0 %v1644_v10 }
 0x717   :  { %1428 = vmatpush3.bf16.msra.mxu0 %v1427_v13 }
 0x718   :  { %1429 = vmatprep.subr.bf16.mxu0 %v1644_v10 }
 0x71b   :  { %1431 = vmatpush3.bf16.msra.mxu0 %v1430_v58 }
 0x71c   :  { %1432 = vmatprep.subr.bf16.mxu0 %v1644_v10 }
 0x71f   :  { %1434 = vmatpush3.bf16.msra.mxu0 %v1433_v15 }
 0x720   :  { %1435 = vmatprep.subr.bf16.mxu0 %v1644_v10 }
 0x723   :  { %1437 = vmatpush3.bf16.msra.mxu0 %v1436_v18 }
 0x724   :  { %1438 = vmatprep.subr.bf16.mxu0 %v1644_v10 }
 0x727   :  { %1440 = vmatpush3.bf16.msra.mxu0 %v1439_v21 }
 0x728   :  { %1441 = vmatprep.subr.bf16.mxu0 %v1644_v10 }
 0x72b   :  { %1443 = vmatpush3.bf16.msra.mxu0 %v1442_v24 }
 0x72c   :  { %1444 = vmatprep.subr.bf16.mxu0 %v1644_v10 }
 0x72f   :  { %1446 = vmatpush3.bf16.msra.mxu0 %v1445_v29 }
 0x7e5   :  { %v1162_v47 = vpop.f32.mrb[28].mxu0  ;;  %v1203_v63 = vpop.f32.mrb[28].mxu1 }
 0x7e6   :  { %v1210_v60 = vadd.f32 %v1162_v47, %v1123_v46  ;;  %v1164_v28 = vpop.f32.mrb[29].mxu0  ;;  %v1205_v39 = vpop.f32.mrb[29].mxu1  ;;  %v1212_v50 = vadd.f32 %v1203_v63, %v1125_v43 }
 0x7e7   :  { %v1211_v41 = vadd.f32 %v1164_v28, %v1124_v33  ;;  %v1166_v54 = vpop.f32.mrb[30].mxu0  ;;  %v1207_v42 = vpop.f32.mrb[30].mxu1  ;;  %v1213_v52 = vadd.f32 %v1205_v39, %v1126_v49 }
 0x7e8   :  { %v1214_v62 = vmul.f32 0.5, %v1210_v60  ;;  %v1167_v44 = vpop.f32.mrb[31].mxu0  ;;  %v1208_v36 = vpop.f32.mrb[31].mxu1 }
 0x7e9   :  { %v1218_v48 = vmul.f32 0.5, %v1211_v41  ;;  %v1223_v40 = vmul.f32 0.5, %v1213_v52 }
 0x7ea   :  { %1574 = vtanh.f32 %v1214_v62 }
 0x7eb   :  { %1576 = vtanh.f32 %v1218_v48 }
 0x7ec   :  { %1578 = vtanh.f32 %v1212_v50 }
 0x7ed   :  { %1580 = vtanh.f32 %v1223_v40 }
 0x7f4   :  { %v1575_v45 = vpop.eup %1574 }
 0x7f5   :  { %v1577_v37 = vpop.eup %1576  ;;  %v1216_v57 = vmul.f32 0.5, %v1575_v45 }
 0x7f6   :  { %v1220_v3 = vmul.f32 0.5, %v1577_v37  ;;  %v1579_v5 = vpop.eup %1578 }
 0x7f7   :  { %v1217_v53 = vadd.f32 0.5, %v1216_v57  ;;  %v1581_v8 = vpop.eup %1580 }
 0x7f8   :  { %v1221_v6 = vadd.f32 0.5, %v1220_v3  ;;  %v1225_v0 = vmul.f32 0.5, %v1581_v8 }
 0x7f9   :  { %v1228_v56 = vmul.f32 %v1579_v5, %v1217_v53 }
 0x7fa   :  { %v1227_v55 = vmul.f32 %v1221_v6, %v2161_v4  ;;  %v1226_v9 = vadd.f32 0.5, %v1225_v0 }
 0x7fc   :  { %v1229_v7 = vadd.f32 %v1228_v56, %v1227_v55 }
 0x7fe   :  { %1582 = vtanh.f32 %v1229_v7 }
 0x808   :  { %v1583_v27 = vpop.eup %1582 }
 0x809   :  { %v1231_v61 = vmul.f32 %v1583_v27, %v1226_v9 }
 0x80b   :  { %1421 = vmatmul.mubr.f32.vlgmr.msra.gmra.mrb[32].mxu0 %v1231_v61 }
 0x8de   :  { %v1321_v10 = vpop.f32.mrb[32].mxu0 }
 0x8df   :  { %v1322_v11 = vadd.f32 %v1370_v51, %v1321_v10  ;;  %v1422_v12 = vpop.f32.mrb[33].mxu0 }
 0x8e1   :  { %1325 = vst [vmem:[%s2233_s6] sm:$0xff] %v1322_v11 }
 0x8e2   :  { %1330 = vsyncpa [#allocation3], 1 }

</bundles_post_ra>
